<compile_context>
chip_gen: v6e
topology: v6e:2x2x1
jax: 0.10.0
libtpu: 0.0.40
codegen_flags: <defaults>
</compile_context>

<pallas_src>
import jax
import jax.numpy as jnp
from jax.experimental import pallas as pl
from jax.experimental.pallas import tpu as pltpu

_HIGHEST = jax.lax.Precision.HIGHEST


def ffnn_kernel(x_ref,
                w1_ref, b1_ref,
                w2_ref, b2_ref,
                w3_ref, b3_ref,
                w4_ref, b4_ref,
                o_ref):
    x = x_ref[...]

    # layer1 + ReLU : (TB,784) @ (784,64) + (1,64)   (f32 accumulation)
    h = jnp.dot(x, w1_ref[...],
                preferred_element_type=jnp.float32, precision=_HIGHEST)
    h = jnp.maximum(h + b1_ref[...], 0.0)

    # layer2 + ReLU : (TB,64) @ (64,32) + (1,32)
    h = jnp.dot(h, w2_ref[...],
                preferred_element_type=jnp.float32, precision=_HIGHEST)
    h = jnp.maximum(h + b2_ref[...], 0.0)

    # layer3 + ReLU : (TB,32) @ (32,16) + (1,16)
    h = jnp.dot(h, w3_ref[...],
                preferred_element_type=jnp.float32, precision=_HIGHEST)
    h = jnp.maximum(h + b3_ref[...], 0.0)

    # layer4 : (TB,16) @ (16,10) + (1,10)
    logits = jnp.dot(h, w4_ref[...],
                     preferred_element_type=jnp.float32, precision=_HIGHEST)
    logits = logits + b4_ref[...]

    # Softmax over dim=1 (last axis), numerically stable.
    m = jnp.max(logits, axis=-1, keepdims=True)
    e = jnp.exp(logits - m)
    inv = 1.0 / jnp.sum(e, axis=-1, keepdims=True)   # one recip per row
    o_ref[...] = (e * inv).astype(o_ref.dtype)


def _round_up(n, m):
    return ((n + m - 1) // m) * m


def ffnn_forward(x, params, *, tb=1024, stream_bf16=False):
    assert x.ndim == 2, "input_x must be of rank 2"
    assert x.shape[1] == 784, "input_x must have 784 features"
    B = x.shape[0]
    (w1, b1), (w2, b2), (w3, b3), (w4, b4) = params

    if stream_bf16:
        # Halve the dominant HBM stream; MXU still accumulates in f32.
        x = x.astype(jnp.bfloat16)
        w1 = w1.astype(jnp.bfloat16)

    # Batch tile: multiple of the sublane packing (8 for f32, 16 for bf16),
    # capped at 2048 so the double-buffered x stream fits every generation's
    # scoped-VMEM default (v5e 16 MiB, v6e/v7x 32 MiB).
    sub = 16 if stream_bf16 else 8
    TB = min(_round_up(min(tb, 2048), sub), _round_up(B, sub))
    grid = (pl.cdiv(B, TB),)   # ragged last tile handled by Pallas (masked writes)

    # Weights/biases: constant index_map -> DMA'd once, VMEM-resident.
    const_spec = lambda a: pl.BlockSpec(a.shape, lambda i: (0,) * a.ndim)

    flops_per_row = 2 * (784 * 64 + 64 * 32 + 32 * 16 + 16 * 10)  # 105_792
    weight_bytes = sum(int(a.size) * a.dtype.itemsize
                       for a in (w1, b1, w2, b2, w3, b3, w4, b4))
    cost = pl.CostEstimate(
        flops=B * flops_per_row,
        bytes_accessed=B * (784 * x.dtype.itemsize + 10 * 4) + weight_bytes,
        transcendentals=B * 10,
    )

    out = pl.pallas_call(
        ffnn_kernel,
        out_shape=jax.ShapeDtypeStruct((B, 10), jnp.float32),
        grid=grid,
        in_specs=[
            pl.BlockSpec((TB, 784), lambda i: (i, 0)),   # x: streamed per tile
            const_spec(w1), const_spec(b1),
            const_spec(w2), const_spec(b2),
            const_spec(w3), const_spec(b3),
            const_spec(w4), const_spec(b4),
        ],
        out_specs=pl.BlockSpec((TB, 10), lambda i: (i, 0)),
        compiler_params=pltpu.CompilerParams(
            dimension_semantics=(pltpu.PARALLEL,),
        ),
        cost_estimate=cost,
    )(x, w1, b1, w2, b2, w3, b3, w4, b4)

    return out


def init_params(key):
    """Deterministic init mimicking torch.nn.Linear defaults (U[-1/sqrt(fan_in), +])."""
    sizes = [(784, 64), (64, 32), (32, 16), (16, 10)]
    params = []
    for fan_in, fan_out in sizes:
        kw, kb, key = jax.random.split(key, 3)
        bound = 1.0 / jnp.sqrt(jnp.float32(fan_in))
        # Stored as (in, out) so kernel does x @ W directly.
        w = jax.random.uniform(kw, (fan_in, fan_out), jnp.float32, -bound, bound)
        b = jax.random.uniform(kb, (1, fan_out), jnp.float32, -bound, bound)
        params.append((w, b))
    return params


def reference_forward(x, params):
    h = x
    for i, (w, b) in enumerate(params):
        h = jnp.dot(h, w, precision=_HIGHEST) + b
        if i < 3:
            h = jnp.maximum(h, 0.0)
    return jax.nn.softmax(h, axis=1)


if __name__ == "__main__":
    key = jax.random.PRNGKey(0)
    kx, kp = jax.random.split(key)
    params = init_params(kp)

    # Primary small-shape check (batch=8), f32 path.
    batch = 8
    x = jax.random.normal(kx, (batch, 784), jnp.float32)
    out = jax.block_until_ready(ffnn_forward(x, params))
    ref = reference_forward(x, params)
    assert out.shape == (batch, 10)
    assert jnp.allclose(out, ref, atol=1e-5, rtol=1e-5), "mismatch vs reference"
    assert jnp.allclose(jnp.sum(out, axis=1), 1.0, atol=1e-5), "softmax rows must sum to 1"

    # Multi-tile grid + ragged last-tile path (tb forced small so grid > 1 and
    # B is not tile-aligned; no wrapper-side padding anymore).
    batch2 = 20
    x2 = jax.random.normal(jax.random.PRNGKey(1), (batch2, 784), jnp.float32)
    out2 = jax.block_until_ready(ffnn_forward(x2, params, tb=8))
    ref2 = reference_forward(x2, params)
    assert out2.shape == (batch2, 10)
    assert jnp.allclose(out2, ref2, atol=1e-5, rtol=1e-5), "multi-tile mismatch vs reference"

    # Optional bf16 streaming path (relaxed tolerance: input stream is bf16,
    # accumulation stays f32).
    out3 = jax.block_until_ready(ffnn_forward(x2, params, stream_bf16=True))
    assert out3.shape == (batch2, 10)
    assert jnp.allclose(out3, ref2, atol=2e-2), "bf16-stream mismatch vs reference"
    assert jnp.allclose(jnp.sum(out3, axis=1), 1.0, atol=1e-2), "bf16 softmax rows must sum to ~1"

    print("KERNEL_OK")
</pallas_src>

<mosaic_0001>
module attributes {stable_mosaic.version = 11 : i64} {
  func.func @ffnn_kernel(%arg0: i32, %arg1: memref<8x784xf32, #tpu.memory_space<vmem>>, %arg2: memref<784x64xf32, #tpu.memory_space<vmem>>, %arg3: memref<1x64xf32, #tpu.memory_space<vmem>>, %arg4: memref<64x32xf32, #tpu.memory_space<vmem>>, %arg5: memref<1x32xf32, #tpu.memory_space<vmem>>, %arg6: memref<32x16xf32, #tpu.memory_space<vmem>>, %arg7: memref<1x16xf32, #tpu.memory_space<vmem>>, %arg8: memref<16x10xf32, #tpu.memory_space<vmem>>, %arg9: memref<1x10xf32, #tpu.memory_space<vmem>>, %arg10: memref<8x10xf32, #tpu.memory_space<vmem>>) attributes {dimension_semantics = [#tpu.dimension_semantics<parallel>], iteration_bounds = array<i64: 1>, scalar_prefetch = 0 : i64, scratch_operands = 0 : i64, tpu.core_type = #tpu.core_type<tc>, window_params = [{transform_indices = @transform_0, window_bounds = array<i64: 8, 784>}, {pipeline_mode = #tpu.pipeline_mode<synchronous>, transform_indices = @transform_1, window_bounds = array<i64: 784, 64>}, {pipeline_mode = #tpu.pipeline_mode<synchronous>, transform_indices = @transform_2, window_bounds = array<i64: 1, 64>}, {pipeline_mode = #tpu.pipeline_mode<synchronous>, transform_indices = @transform_3, window_bounds = array<i64: 64, 32>}, {pipeline_mode = #tpu.pipeline_mode<synchronous>, transform_indices = @transform_4, window_bounds = array<i64: 1, 32>}, {pipeline_mode = #tpu.pipeline_mode<synchronous>, transform_indices = @transform_5, window_bounds = array<i64: 32, 16>}, {pipeline_mode = #tpu.pipeline_mode<synchronous>, transform_indices = @transform_6, window_bounds = array<i64: 1, 16>}, {pipeline_mode = #tpu.pipeline_mode<synchronous>, transform_indices = @transform_7, window_bounds = array<i64: 16, 10>}, {pipeline_mode = #tpu.pipeline_mode<synchronous>, transform_indices = @transform_8, window_bounds = array<i64: 1, 10>}, {transform_indices = @transform_9, window_bounds = array<i64: 8, 10>}]} {
    %c0 = arith.constant 0 : index
    %c0_0 = arith.constant 0 : index
    %0 = vector.load %arg1[%c0, %c0_0] : memref<8x784xf32, #tpu.memory_space<vmem>>, vector<8x784xf32>
    %c0_1 = arith.constant 0 : index
    %c0_2 = arith.constant 0 : index
    %1 = vector.load %arg2[%c0_1, %c0_2] : memref<784x64xf32, #tpu.memory_space<vmem>>, vector<784x64xf32>
    %cst = arith.constant dense<0.000000e+00> : vector<8x64xf32>
    %2 = tpu.matmul %0, %1, %cst {dimension_numbers = #tpu.dot_dimension_numbers<[1], [0], [0], [1], [0, 0, 1, 1], [], []>, precision = #tpu.contract_precision<fp32>} : vector<8x784xf32>, vector<784x64xf32>, vector<8x64xf32> -> vector<8x64xf32>
    %c0_3 = arith.constant 0 : index
    %c0_4 = arith.constant 0 : index
    %3 = vector.load %arg3[%c0_3, %c0_4] : memref<1x64xf32, #tpu.memory_space<vmem>>, vector<1x64xf32>
    %4 = vector.broadcast %3 : vector<1x64xf32> to vector<8x64xf32>
    %5 = arith.addf %2, %4 : vector<8x64xf32>
    %cst_5 = arith.constant 0.000000e+00 : f32
    %6 = vector.broadcast %cst_5 : f32 to vector<8x64xf32>
    %7 = arith.maximumf %5, %6 : vector<8x64xf32>
    %c0_6 = arith.constant 0 : index
    %c0_7 = arith.constant 0 : index
    %8 = vector.load %arg4[%c0_6, %c0_7] : memref<64x32xf32, #tpu.memory_space<vmem>>, vector<64x32xf32>
    %cst_8 = arith.constant dense<0.000000e+00> : vector<8x32xf32>
    %9 = tpu.matmul %7, %8, %cst_8 {dimension_numbers = #tpu.dot_dimension_numbers<[1], [0], [0], [1], [0, 0, 1, 1], [], []>, precision = #tpu.contract_precision<fp32>} : vector<8x64xf32>, vector<64x32xf32>, vector<8x32xf32> -> vector<8x32xf32>
    %c0_9 = arith.constant 0 : index
    %c0_10 = arith.constant 0 : index
    %10 = vector.load %arg5[%c0_9, %c0_10] : memref<1x32xf32, #tpu.memory_space<vmem>>, vector<1x32xf32>
    %11 = vector.broadcast %10 : vector<1x32xf32> to vector<8x32xf32>
    %12 = arith.addf %9, %11 : vector<8x32xf32>
    %cst_11 = arith.constant 0.000000e+00 : f32
    %13 = vector.broadcast %cst_11 : f32 to vector<8x32xf32>
    %14 = arith.maximumf %12, %13 : vector<8x32xf32>
    %c0_12 = arith.constant 0 : index
    %c0_13 = arith.constant 0 : index
    %15 = vector.load %arg6[%c0_12, %c0_13] : memref<32x16xf32, #tpu.memory_space<vmem>>, vector<32x16xf32>
    %cst_14 = arith.constant dense<0.000000e+00> : vector<8x16xf32>
    %16 = tpu.matmul %14, %15, %cst_14 {dimension_numbers = #tpu.dot_dimension_numbers<[1], [0], [0], [1], [0, 0, 1, 1], [], []>, precision = #tpu.contract_precision<fp32>} : vector<8x32xf32>, vector<32x16xf32>, vector<8x16xf32> -> vector<8x16xf32>
    %c0_15 = arith.constant 0 : index
    %c0_16 = arith.constant 0 : index
    %17 = vector.load %arg7[%c0_15, %c0_16] : memref<1x16xf32, #tpu.memory_space<vmem>>, vector<1x16xf32>
    %18 = vector.broadcast %17 : vector<1x16xf32> to vector<8x16xf32>
    %19 = arith.addf %16, %18 : vector<8x16xf32>
    %cst_17 = arith.constant 0.000000e+00 : f32
    %20 = vector.broadcast %cst_17 : f32 to vector<8x16xf32>
    %21 = arith.maximumf %19, %20 : vector<8x16xf32>
    %c0_18 = arith.constant 0 : index
    %c0_19 = arith.constant 0 : index
    %22 = vector.load %arg8[%c0_18, %c0_19] : memref<16x10xf32, #tpu.memory_space<vmem>>, vector<16x10xf32>
    %cst_20 = arith.constant dense<0.000000e+00> : vector<8x10xf32>
    %23 = tpu.matmul %21, %22, %cst_20 {dimension_numbers = #tpu.dot_dimension_numbers<[1], [0], [0], [1], [0, 0, 1, 1], [], []>, precision = #tpu.contract_precision<fp32>} : vector<8x16xf32>, vector<16x10xf32>, vector<8x10xf32> -> vector<8x10xf32>
    %c0_21 = arith.constant 0 : index
    %c0_22 = arith.constant 0 : index
    %24 = vector.load %arg9[%c0_21, %c0_22] : memref<1x10xf32, #tpu.memory_space<vmem>>, vector<1x10xf32>
    %25 = vector.broadcast %24 : vector<1x10xf32> to vector<8x10xf32>
    %26 = arith.addf %23, %25 : vector<8x10xf32>
    %cst_23 = arith.constant dense<0xFF800000> : vector<8xf32>
    %27 = vector.multi_reduction <maximumf>, %26, %cst_23 [1] : vector<8x10xf32> to vector<8xf32>
    %28 = vector.shape_cast %27 : vector<8xf32> to vector<8x1xf32>
    %29 = vector.broadcast %28 : vector<8x1xf32> to vector<8x10xf32>
    %30 = arith.subf %26, %29 : vector<8x10xf32>
    %31 = math.exp %30 : vector<8x10xf32>
    %cst_24 = arith.constant dense<0.000000e+00> : vector<8xf32>
    %32 = vector.multi_reduction <add>, %31, %cst_24 [1] : vector<8x10xf32> to vector<8xf32>
    %33 = vector.shape_cast %32 : vector<8xf32> to vector<8x1xf32>
    %cst_25 = arith.constant 1.000000e+00 : f32
    %34 = vector.broadcast %cst_25 : f32 to vector<8x1xf32>
    %35 = arith.divf %34, %33 : vector<8x1xf32>
    %36 = vector.broadcast %35 : vector<8x1xf32> to vector<8x10xf32>
    %37 = arith.mulf %31, %36 : vector<8x10xf32>
    %c0_26 = arith.constant 0 : index
    %c0_27 = arith.constant 0 : index
    %38 = vector.load %arg10[%c0_26, %c0_27] : memref<8x10xf32, #tpu.memory_space<vmem>>, vector<8x10xf32>
    tpu.vector_store %arg10[%c0_26, %c0_27], %37 {strides = array<i32>} : memref<8x10xf32, #tpu.memory_space<vmem>>, vector<8x10xf32>,
    return
  }
  func.func @transform_0(%arg0: i32) -> (i32, i32) {
    %c0_i32 = arith.constant 0 : i32
    %c0_i32_0 = arith.constant 0 : i32
    return %arg0, %c0_i32 : i32, i32
  }
  func.func @transform_1(%arg0: i32) -> (i32, i32) {
    %c0_i32 = arith.constant 0 : i32
    %c0_i32_0 = arith.constant 0 : i32
    %c0_i32_1 = arith.constant 0 : i32
    return %c0_i32, %c0_i32_0 : i32, i32
  }
  func.func @transform_2(%arg0: i32) -> (i32, i32) {
    %c0_i32 = arith.constant 0 : i32
    %c0_i32_0 = arith.constant 0 : i32
    %c0_i32_1 = arith.constant 0 : i32
    return %c0_i32, %c0_i32_0 : i32, i32
  }
  func.func @transform_3(%arg0: i32) -> (i32, i32) {
    %c0_i32 = arith.constant 0 : i32
    %c0_i32_0 = arith.constant 0 : i32
    %c0_i32_1 = arith.constant 0 : i32
    return %c0_i32, %c0_i32_0 : i32, i32
  }
  func.func @transform_4(%arg0: i32) -> (i32, i32) {
    %c0_i32 = arith.constant 0 : i32
    %c0_i32_0 = arith.constant 0 : i32
    %c0_i32_1 = arith.constant 0 : i32
    return %c0_i32, %c0_i32_0 : i32, i32
  }
  func.func @transform_5(%arg0: i32) -> (i32, i32) {
    %c0_i32 = arith.constant 0 : i32
    %c0_i32_0 = arith.constant 0 : i32
    %c0_i32_1 = arith.constant 0 : i32
    return %c0_i32, %c0_i32_0 : i32, i32
  }
  func.func @transform_6(%arg0: i32) -> (i32, i32) {
    %c0_i32 = arith.constant 0 : i32
    %c0_i32_0 = arith.constant 0 : i32
    %c0_i32_1 = arith.constant 0 : i32
    return %c0_i32, %c0_i32_0 : i32, i32
  }
  func.func @transform_7(%arg0: i32) -> (i32, i32) {
    %c0_i32 = arith.constant 0 : i32
    %c0_i32_0 = arith.constant 0 : i32
    %c0_i32_1 = arith.constant 0 : i32
    return %c0_i32, %c0_i32_0 : i32, i32
  }
  func.func @transform_8(%arg0: i32) -> (i32, i32) {
    %c0_i32 = arith.constant 0 : i32
    %c0_i32_0 = arith.constant 0 : i32
    %c0_i32_1 = arith.constant 0 : i32
    return %c0_i32, %c0_i32_0 : i32, i32
  }
  func.func @transform_9(%arg0: i32) -> (i32, i32) {
    %c0_i32 = arith.constant 0 : i32
    %c0_i32_0 = arith.constant 0 : i32
    return %arg0, %c0_i32 : i32, i32
  }
}

</mosaic_0001>

<bundles_post_ra>
// kernel: tpu_custom_call.1
= control target key start
LH: loop header
LB: loop body
LE: loop exit
PB: predicated region body
PF: predicated region fallthrough
CT: control target
= control target key end

     0   :  { %s8336_s0 = inlined_call_operand.vmem [shape: f32[8,784], index: 0, kind: input, shape index: {}]   ;;  %s8337_s1 = inlined_call_operand.vmem [shape: f32[784,64], index: 1, kind: input, shape index: {}]   ;;  %s8338_s2 = inlined_call_operand.vmem [shape: f32[1,64], index: 2, kind: input, shape index: {}]   ;;  %s8339_s3 = inlined_call_operand.vmem [shape: f32[64,32], index: 3, kind: input, shape index: {}]   ;;  %s8340_s4 = inlined_call_operand.vmem [shape: f32[1,32], index: 4, kind: input, shape index: {}]   ;;  %s8341_s5 = inlined_call_operand.vmem [shape: f32[32,16], index: 5, kind: input, shape index: {}]   ;;  %s8342_s6 = inlined_call_operand.vmem [shape: f32[1,16], index: 6, kind: input, shape index: {}]   ;;  %s8343_s7 = inlined_call_operand.vmem [shape: f32[16,10], index: 7, kind: input, shape index: {}]   ;;  %s8344_s8 = inlined_call_operand.vmem [shape: f32[1,10], index: 8, kind: input, shape index: {}]   ;;  %s8345_s9 = inlined_call_operand.hbm [shape: f32[8,10], index: 9, kind: output, shape index: {}]  }
   0x1   :  { %v71_v0 = vld [vmem:[%s8337_s1 + $0xf8] sm:$0xff]  ;;  %v70_v2 = vld [vmem:[%s8337_s1 + $0xf0] sm:$0xff]  ;;  %v69_v7 = vld [vmem:[%s8337_s1 + $0xe8] sm:$0xff] }
   0x2   :  { %v55_v1 = vld [vmem:[%s8337_s1 + $0x78] sm:$0xff]  ;;  %v5861_v3 = vand.u32 4294901760, %v71_v0  ;;  %v5865_v5 = vand.u32 4294901760, %v70_v2  ;;  %v54_v6 = vld [vmem:[%s8337_s1 + $0x70] sm:$0xff]  ;;  %v53_v8 = vld [vmem:[%s8337_s1 + $0x68] sm:$0xff]  ;;  %v5878_v10 = vand.u32 4294901760, %v69_v7 }
   0x3   :  { %v5863_v4 = vand.u32 4294901760, %v55_v1  ;;  %v5876_v9 = vand.u32 4294901760, %v54_v6  ;;  %v5880_v11 = vand.u32 4294901760, %v53_v8  ;;  %v68_v12 = vld [vmem:[%s8337_s1 + $0xe0] sm:$0xff]  ;;  %v67_v14 = vld [vmem:[%s8337_s1 + $0xd8] sm:$0xff]  ;;  %v5909_v20 = vld [vmem:[%s8337_s1 + $0xd0] sm:$0xff] }
   0x4   :  { %v52_v13 = vld [vmem:[%s8337_s1 + $0x60] sm:$0xff]  ;;  %4756 = vmatprep.subr.mxu0 %v5861_v3  ;;  %v5892_v15 = vand.u32 4294901760, %v68_v12  ;;  %v5896_v17 = vand.u32 4294901760, %v67_v14  ;;  %v5899_v18 = vsub.f32 %v71_v0, %v5861_v3  ;;  %v5904_v19 = vld [vmem:[%s8337_s1 + $0x58] sm:$0xff]  ;;  %v5914_v21 = vld [vmem:[%s8337_s1 + $0x50] sm:$0xff]  ;;  %v5924_v24 = vand.u32 4294901760, %v5909_v20 }
   0x5   :  { %v5894_v16 = vand.u32 4294901760, %v52_v13  ;;  %4757 = vmatpush3.msra.mxu0 %v5863_v4  ;;  %v5918_v22 = vand.u32 4294901760, %v5904_v19  ;;  %v5921_v23 = vsub.f32 %v55_v1, %v5863_v4  ;;  %v5927_v25 = vsub.f32 %v70_v2, %v5865_v5  ;;  %v5932_v26 = vld [vmem:[%s8337_s1 + $0xc8] sm:$0xff]  ;;  %v5942_v28 = vld [vmem:[%s8337_s1 + $0xc0] sm:$0xff]  ;;  %v5994_v46 = vld [vmem:[%s8337_s1 + $0xb8] sm:$0xff] }
   0x6   :  { %v5937_v27 = vld [vmem:[%s8337_s1 + $0x48] sm:$0xff]  ;;  %4758 = vmatprep.subr.mxu0 %v5865_v5  ;;  %v8359_v29 = vand.u32 4294901760, %v5899_v18  ;;  %v5947_v30 = vand.u32 4294901760, %v5914_v21  ;;  %v5950_v31 = vsub.f32 %v54_v6, %v5876_v9  ;;  %v5953_v32 = vand.u32 4294901760, %v5932_v26  ;;  %v5967_v37 = vld [vmem:[%s8337_s1 + $0x40] sm:$0xff]  ;;  %v6007_v51 = vld [vmem:[%s8337_s1 + $0x38] sm:$0xff] }
   0x7   :  { %4759 = vmatpush3.msra.mxu0 %v5876_v9  ;;  %v8358_v33 = vand.u32 4294901760, %v5921_v23  ;;  %v8356_v34 = vand.u32 4294901760, %v5927_v25  ;;  %v5959_v35 = vsub.f32 %v69_v7, %v5878_v10  ;;  %v5962_v36 = vand.u32 4294901760, %v5937_v27  ;;  %v6017_v56 = vld [vmem:[%s8337_s1 + $0xb0] sm:$0xff]  ;;  %v6047_v2 = vld [vmem:[%s8337_s1 + $0xa8] sm:$0xff] }
   0x8   :  { %8549 = vst [vmem:[#allocation5_spill] sm:$0xff] %v5947_v30  ;;  %8550 = vst [vmem:[#allocation6_spill] sm:$0xff] %v5953_v32  ;;  %4760 = vmatprep.subr.mxu0 %v5878_v10  ;;  %v377_v38 = vsub.f32 %v5899_v18, %v8359_v29  ;;  %v8355_v39 = vand.u32 4294901760, %v5950_v31  ;;  %v5975_v40 = vsub.f32 %v53_v8, %v5880_v11  ;;  %v5978_v41 = vand.u32 4294901760, %v5942_v28  ;;  %v6032_v61 = vld [vmem:[%s8337_s1 + $0x30] sm:$0xff] }
   0x9   :  { %8551 = vst [vmem:[#allocation7_spill] sm:$0xff] %v5962_v36  ;;  %4761 = vmatpush3.msra.mxu0 %v5880_v11  ;;  %v265_v42 = vsub.f32 %v5921_v23, %v8358_v33  ;;  %v384_v43 = vsub.f32 %v5927_v25, %v8356_v34  ;;  %v8353_v44 = vand.u32 4294901760, %v5959_v35  ;;  %v5989_v45 = vsub.f32 %v68_v12, %v5892_v15  ;;  %v6183_v33 = vld [vmem:[%s8337_s1 + $0x88] sm:$0xff] }
   0xa   :  { %8552 = vst [vmem:[#allocation8_spill] sm:$0xff] %v5978_v41  ;;  %4762 = vmatprep.subr.mxu0 %v5892_v15  ;;  %v378_v47 = vand.u32 4294901760, %v377_v38  ;;  %v272_v48 = vsub.f32 %v5950_v31, %v8355_v39  ;;  %v8351_v49 = vand.u32 4294901760, %v5975_v40  ;;  %v6002_v50 = vand.u32 4294901760, %v5967_v37 }
   0xb   :  { %4763 = vmatpush3.msra.mxu0 %v5894_v16  ;;  %v266_v52 = vand.u32 4294901760, %v265_v42  ;;  %v385_v53 = vand.u32 4294901760, %v384_v43  ;;  %v391_v54 = vsub.f32 %v5959_v35, %v8353_v44  ;;  %v8350_v55 = vand.u32 4294901760, %v5989_v45  ;;  %v6156_v44 = vld [vmem:[%s8337_s1 + $0x90] sm:$0xff] }
   0xc   :  { %8553 = vst [vmem:[#allocation9_spill] sm:$0xff] %v6002_v50  ;;  %4764 = vmatprep.subr.mxu0 %v5896_v17  ;;  %4791 = vmatprep.subr.mxu1 %v378_v47  ;;  %v273_v57 = vand.u32 4294901760, %v272_v48  ;;  %v279_v58 = vsub.f32 %v5975_v40, %v8351_v49  ;;  %v6024_v59 = vsub.f32 %v52_v13, %v5894_v16  ;;  %v6027_v60 = vand.u32 4294901760, %v5994_v46  ;;  %v6061_v13 = vld [vmem:[%s8337_s1 + $0x28] sm:$0xff]  ;;  %v6140_v49 = vld [vmem:[%s8337_s1 + $0x18] sm:$0xff] }
   0xd   :  { %4765 = vmatpush3.msra.mxu0 %v5918_v22  ;;  %4792 = vmatpush3.msra.mxu1 %v266_v52  ;;  %v392_v62 = vand.u32 4294901760, %v391_v54  ;;  %v398_v63 = vsub.f32 %v5989_v45, %v8350_v55  ;;  %v6039_v0 = vsub.f32 %v67_v14, %v5896_v17  ;;  %v6042_v1 = vand.u32 4294901760, %v6007_v51 }
   0xe   :  { %8554 = vst [vmem:[#allocation10_spill] sm:$0xff] %v6027_v60  ;;  %4766 = vmatprep.subr.mxu0 %v5924_v24  ;;  %4793 = vmatprep.subr.mxu1 %v385_v53  ;;  %v280_v6 = vand.u32 4294901760, %v279_v58  ;;  %v8348_v7 = vand.u32 4294901760, %v6024_v59  ;;  %v6053_v8 = vsub.f32 %v5904_v19, %v5918_v22  ;;  %v6056_v12 = vand.u32 4294901760, %v6017_v56 }
   0xf   :  { %8555 = vst [vmem:[#allocation11_spill] sm:$0xff] %v6042_v1  ;;  %4767 = vmatpush3.msra.mxu0 %v5947_v30  ;;  %4794 = vmatpush3.msra.mxu1 %v273_v57  ;;  %v399_v14 = vand.u32 4294901760, %v398_v63  ;;  %v8346_v38 = vand.u32 4294901760, %v6039_v0  ;;  %v6067_v42 = vsub.f32 %v5909_v20, %v5924_v24  ;;  %v6070_v19 = vand.u32 4294901760, %v6032_v61  ;;  %v6087_v20 = vld [vmem:[%s8337_s1 + $0xa0] sm:$0xff] }
  0x10   :  { %8556 = vst [vmem:[#allocation12_spill] sm:$0xff] %v6056_v12  ;;  %4768 = vmatprep.subr.mxu0 %v5953_v32  ;;  %4795 = vmatprep.subr.mxu1 %v392_v62  ;;  %v286_v43 = vsub.f32 %v6024_v59, %v8348_v7  ;;  %v8347_v47 = vand.u32 4294901760, %v6053_v8  ;;  %v6079_v48 = vsub.f32 %v5914_v21, %v5947_v30  ;;  %v6082_v52 = vand.u32 4294901760, %v6047_v2 }
  0x11   :  { %8557 = vst [vmem:[#allocation13_spill] sm:$0xff] %v6070_v19  ;;  %4769 = vmatpush3.msra.mxu0 %v5962_v36  ;;  %4796 = vmatpush3.msra.mxu1 %v280_v6  ;;  %v405_v53 = vsub.f32 %v6039_v0, %v8346_v38  ;;  %v8349_v54 = vand.u32 4294901760, %v6067_v42  ;;  %v6096_v21 = vsub.f32 %v5932_v26, %v5953_v32  ;;  %v6099_v57 = vand.u32 4294901760, %v6061_v13  ;;  %v6113_v26 = vld [vmem:[%s8337_s1 + $0x20] sm:$0xff] }
  0x12   :  { %8558 = vst [vmem:[#allocation14_spill] sm:$0xff] %v6082_v52  ;;  %4770 = vmatprep.subr.mxu0 %v5978_v41  ;;  %4797 = vmatprep.subr.mxu1 %v399_v14  ;;  %v287_v58 = vand.u32 4294901760, %v286_v43  ;;  %v293_v62 = vsub.f32 %v6053_v8, %v8347_v47  ;;  %v8352_v63 = vand.u32 4294901760, %v6079_v48  ;;  %v6108_v6 = vsub.f32 %v5937_v27, %v5962_v36  ;;  %v6126_v27 = vld [vmem:[%s8337_s1 + $0x98] sm:$0xff] }
  0x13   :  { %8559 = vst [vmem:[#allocation15_spill] sm:$0xff] %v6099_v57  ;;  %4771 = vmatpush3.msra.mxu0 %v6002_v50  ;;  %v406_v38 = vand.u32 4294901760, %v405_v53  ;;  %v412_v14 = vsub.f32 %v6067_v42, %v8349_v54  ;;  %v8354_v43 = vand.u32 4294901760, %v6096_v21  ;;  %v6121_v47 = vand.u32 4294901760, %v6087_v20 }
  0x14   :  { %4798 = vmatpush3.msra.mxu1 %v287_v58  ;;  %4772 = vmatprep.subr.mxu0 %v6027_v60  ;;  %v294_v7 = vand.u32 4294901760, %v293_v62  ;;  %v300_v53 = vsub.f32 %v6079_v48, %v8352_v63  ;;  %v8357_v54 = vand.u32 4294901760, %v6108_v6  ;;  %v6135_v55 = vsub.f32 %v5942_v28, %v5978_v41 }
  0x15   :  { %8560 = vst [vmem:[#allocation16_spill] sm:$0xff] %v6121_v47  ;;  %4799 = vmatprep.subr.mxu1 %v406_v38  ;;  %4773 = vmatpush3.msra.mxu0 %v6042_v1  ;;  %v413_v58 = vand.u32 4294901760, %v412_v14  ;;  %v419_v62 = vsub.f32 %v6096_v21, %v8354_v43  ;;  %v6147_v63 = vand.u32 4294901760, %v6113_v26  ;;  %v6151_v28 = vsub.f32 %v5967_v37, %v6002_v50  ;;  %v6169_v37 = vld [vmem:[%s8337_s1 + $0x10] sm:$0xff] }
  0x16   :  { %4800 = vmatpush3.msra.mxu1 %v294_v7  ;;  %4774 = vmatprep.subr.mxu0 %v6056_v12  ;;  %v301_v38 = vand.u32 4294901760, %v300_v53  ;;  %v307_v14 = vsub.f32 %v6108_v6, %v8357_v54  ;;  %v8360_v43 = vand.u32 4294901760, %v6135_v55  ;;  %v6164_v39 = vand.u32 4294901760, %v6126_v27 }
  0x17   :  { %8561 = vst [vmem:[#allocation17_spill] sm:$0xff] %v6147_v63  ;;  %4801 = vmatprep.subr.mxu1 %v413_v58  ;;  %4775 = vmatpush3.msra.mxu0 %v6070_v19  ;;  %v420_v7 = vand.u32 4294901760, %v419_v62  ;;  %v8363_v53 = vand.u32 4294901760, %v6151_v28  ;;  %v6175_v34 = vsub.f32 %v5994_v46, %v6027_v60  ;;  %v6178_v54 = vand.u32 4294901760, %v6140_v49 }
  0x18   :  { %4802 = vmatpush3.msra.mxu1 %v301_v38  ;;  %4776 = vmatprep.subr.mxu0 %v6082_v52  ;;  %v308_v58 = vand.u32 4294901760, %v307_v14  ;;  %v426_v62 = vsub.f32 %v6135_v55, %v8360_v43  ;;  %v6191_v46 = vsub.f32 %v6007_v51, %v6042_v1  ;;  %v6194_v29 = vand.u32 4294901760, %v6156_v44 }
  0x19   :  { %8562 = vst [vmem:[#allocation18_spill] sm:$0xff] %v6178_v54 }
  0x1a   :  { %8563 = vst [vmem:[#allocation19_spill] sm:$0xff] %v6194_v29 }
  0x1b   :  { %14 = vsyncpa [#allocation3], 0  ;;  %4803 = vmatprep.subr.mxu1 %v420_v7  ;;  %4777 = vmatpush3.msra.mxu0 %v6099_v57  ;;  %v314_v38 = vsub.f32 %v6151_v28, %v8363_v53  ;;  %v6203_v43 = vsub.f32 %v6017_v56, %v6056_v12  ;;  %v6206_v51 = vand.u32 4294901760, %v6169_v37  ;;  %v6211_v1 = vld [vmem:[%s8337_s1 + $0x8] sm:$0xff]  ;;  %v427_v7 = vand.u32 4294901760, %v426_v62  ;;  %v6225_v12 = vld [vmem:[%s8337_s1 + $0x80] sm:$0xff] }
  0x1c   :  { %4804 = vmatpush3.msra.mxu1 %v308_v58  ;;  %4778 = vmatprep.subr.mxu0 %v6121_v47  ;;  %v6217_v14 = vsub.f32 %v6032_v61, %v6070_v19  ;;  %v6220_v56 = vand.u32 4294901760, %v6183_v33  ;;  %v8567_v60 = vand.u32 4294901760, %v6175_v34  ;;  %v6234_v61 = vsub.f32 %v6047_v2, %v6082_v52  ;;  %v6251_v2 = vld [vmem:[%s8337_s1] sm:$0xff] }
  0x1d   :  { %8564 = vst [vmem:[#allocation20_spill] sm:$0xff] %v6206_v51  ;;  %4779 = vmatpush3.msra.mxu0 %v6147_v63  ;;  %v315_v58 = vand.u32 4294901760, %v314_v38  ;;  %v8380_v53 = vand.u32 4294901760, %v6203_v43  ;;  %4805 = vmatprep.subr.mxu1 %v427_v7  ;;  %v8569_v19 = vand.u32 4294901760, %v6191_v46  ;;  %v6242_v38 = vand.u32 4294901760, %v6211_v1  ;;  %v33_v41 = vld [vmem:[%s8336_s0] sm:$0xff] }
  0x1e   :  { %8565 = vst [vmem:[#allocation21_spill] sm:$0xff] %v6217_v14  ;;  %8566 = vst [vmem:[#allocation22_spill] sm:$0xff] %v6220_v56  ;;  %v433_v62 = vsub.f32 %v6175_v34, %v8567_v60  ;;  %4780 = vmatprep.subr.mxu0 %v6164_v39  ;;  %v6246_v60 = vsub.f32 %v6061_v13, %v6099_v57  ;;  %v6259_v52 = vand.u32 4294901760, %v6225_v12  ;;  %v34_v13 = vld [vmem:[%s8336_s0 + $0x8] sm:$0xff]  ;;  %vm145_vm0 = vcmask 130048  }
  0x1f   :  { %8568 = vst [vmem:[#allocation23_spill] sm:$0xff] %v6234_v61  ;;  %v321_v50 = vsub.f32 %v6191_v46, %v8569_v19  ;;  %4806 = vmatpush3.msra.mxu1 %v315_v58  ;;  %4781 = vmatpush3.msra.mxu0 %v6178_v54  ;;  %v440_v19 = vsub.f32 %v6203_v43, %v8380_v53  ;;  %v8570_v58 = vand.u32 4294901760, %v6217_v14  ;;  %vm5800_vm1 = vmmov 0  }
  0x20   :  { %v434_v7 = vand.u32 4294901760, %v433_v62  ;;  %4782 = vmatprep.subr.mxu0 %v6194_v29  ;;  %v6271_v53 = vsub.f32 %v6087_v20, %v6121_v47  ;;  %v6285_v36 = vsub.f32 %v6113_v26, %v6147_v63  ;;  %v6300_v26 = vand.u32 4294901760, %v33_v41 }
  0x21   :  { %v322_v57 = vand.u32 4294901760, %v321_v50  ;;  %v328_v62 = vsub.f32 %v6217_v14, %v8570_v58  ;;  %v441_v32 = vand.u32 4294901760, %v440_v19  ;;  %4783 = vmatpush3.msra.mxu0 %v6206_v51  ;;  %v8571_v50 = vand.u32 4294901760, %v6234_v61 }
  0x22   :  { %4807 = vmatprep.subr.mxu1 %v434_v7  ;;  %v6281_v58 = vand.u32 4294901760, %v6251_v2  ;;  %4784 = vmatprep.subr.mxu0 %v6220_v56  ;;  %v8572_v7 = vand.u32 4294901760, %v6246_v60  ;;  %v8391_v47 = vand.u32 4294901760, %v6271_v53  ;;  %v6292_v14 = vand.u32 4294901760, %v34_v13  ;;  %8574 = vst [vmem:[#allocation25_spill] sm:$0xff] %v6300_v26 }
  0x23   :  { %v447_v30 = vsub.f32 %v6234_v61, %v8571_v50  ;;  %4808 = vmatpush3.msra.mxu1 %v322_v57  ;;  %v329_v20 = vand.u32 4294901760, %v328_v62  ;;  %4785 = vmatpush3.msra.mxu0 %v6242_v38  ;;  %v8392_v61 = vand.u32 4294901760, %v6285_v36  ;;  %v6298_v57 = vsub.f32 %v6126_v27, %v6164_v39 }
  0x24   :  { %v335_v19 = vsub.f32 %v6246_v60, %v8572_v7  ;;  %8573 = vst [vmem:[#allocation24_spill] sm:$0xff] %v6292_v14  ;;  %4809 = vmatprep.subr.mxu1 %v441_v32  ;;  %4786 = vmatprep.subr.mxu0 %v6259_v52  ;;  %v454_v7 = vsub.f32 %v6271_v53, %v8391_v47  ;;  %vm3210_vm2 = vcmask 523264   ;;  %vm3763_vm3 = vcmask 261120  }
  0x25   :  { %v448_v50 = vand.u32 4294901760, %v447_v30  ;;  %4810 = vmatpush3.msra.mxu1 %v329_v20  ;;  %v6307_v30 = vsub.f32 %v34_v13, %v6292_v14  ;;  %v6311_v32 = vsub.f32 %v6140_v49, %v6178_v54  ;;  %4787 = vmatpush3.msra.mxu0 %v6281_v58  ;;  %v342_v27 = vsub.f32 %v6285_v36, %v8392_v61 }
  0x26   :  { %v336_v62 = vand.u32 4294901760, %v335_v19  ;;  %v6319_v19 = vsub.f32 %v33_v41, %v6300_v26  ;;  %v6323_v13 = vsub.f32 %v6156_v44, %v6194_v29  ;;  %v455_v47 = vand.u32 4294901760, %v454_v7  ;;  %4826 = vmatprep.subr.mxu0 %v5899_v18  ;;  %486 = vmatprep.mubr.f32.mxu1 %v6292_v14 }
  0x27   :  { %4811 = vmatprep.subr.mxu1 %v448_v50  ;;  %v8397_v49 = vand.u32 4294901760, %v6307_v30  ;;  %v8400_v50 = vand.u32 4294901760, %v6311_v32  ;;  %v6330_v61 = vsub.f32 %v6169_v37, %v6206_v51  ;;  %v343_v20 = vand.u32 4294901760, %v342_v27 }
  0x28   :  { %4812 = vmatpush3.msra.mxu1 %v336_v62  ;;  %v8575_v41 = vand.u32 4294901760, %v6298_v57  ;;  %v8576_v62 = vand.u32 4294901760, %v6319_v19  ;;  %v8577_v14 = vand.u32 4294901760, %v6323_v13  ;;  %v6357_v51 = vsub.f32 %v6211_v1, %v6242_v38 }
  0x29   :  { %4813 = vmatprep.subr.mxu1 %v455_v47  ;;  %v248_v7 = vsub.f32 %v6307_v30, %v8397_v49  ;;  %v349_v37 = vsub.f32 %v6311_v32, %v8400_v50  ;;  %v8579_v29 = vand.u32 4294901760, %v6330_v61  ;;  %vm4724_vm4 = vcmask 80896  }
  0x2a   :  { %v461_v54 = vsub.f32 %v6298_v57, %v8575_v41  ;;  %v6347_v41 = vsub.f32 %v6183_v33, %v6220_v56  ;;  %4814 = vmatpush3.msra.mxu1 %v343_v20  ;;  %v254_v47 = vsub.f32 %v6319_v19, %v8576_v62  ;;  %v468_v49 = vsub.f32 %v6323_v13, %v8577_v14 }
  0x2b   :  { %8578 = vst [vmem:[#allocation26_spill] sm:$0xff] %v6357_v51  ;;  %v249_v50 = vand.u32 4294901760, %v248_v7  ;;  %v350_v27 = vand.u32 4294901760, %v349_v37  ;;  %v356_v33 = vsub.f32 %v6330_v61, %v8579_v29  ;;  %v8407_v62 = vand.u32 4294901760, %v6357_v51 }
  0x2c   :  { %v462_v44 = vand.u32 4294901760, %v461_v54  ;;  %v8408_v54 = vand.u32 4294901760, %v6347_v41  ;;  %v255_v20 = vand.u32 4294901760, %v254_v47  ;;  %v469_v56 = vand.u32 4294901760, %v468_v49 }
  0x2d   :  { %v6366_v14 = vsub.f32 %v6225_v12, %v6259_v52  ;;  %250 = vmatprep.mubr.f32.mxu0 %v249_v50  ;;  %v357_v1 = vand.u32 4294901760, %v356_v33  ;;  %v6373_v29 = vsub.f32 %v6251_v2, %v6281_v58  ;;  %v363_v49 = vsub.f32 %v6357_v51, %v8407_v62  ;;  %v8582_v33 = vld [vmem:[#allocation21_spill] sm:$0xff]  ;;  %v8595_v62 = vld [vmem:[#allocation16_spill] sm:$0xff] }
  0x2e   :  { %4815 = vmatprep.subr.mxu1 %v462_v44  ;;  %v475_v7 = vsub.f32 %v6347_v41, %v8408_v54  ;;  %256 = vmatmul.mubr.f32.vlgmr.msra.gmra.mxu0 %v255_v20  ;;  %v8583_v20 = vld [vmem:[#allocation5_spill] sm:$0xff]  ;;  %v8596_v54 = vand.u32 4294901760, %v5899_v18  ;;  %v8604_v18 = vand.u32 4294901760, %v5959_v35 }
  0x2f   :  { %8580 = vst [vmem:[#allocation27_spill] sm:$0xff] %v6366_v14  ;;  %4816 = vmatpush3.msra.mxu1 %v350_v27  ;;  %8581 = vst [vmem:[#allocation28_spill] sm:$0xff] %v6373_v29  ;;  %v8406_v12 = vand.u32 4294901760, %v6366_v14  ;;  %4827 = vmatpush3.msra.mxu0 %v5921_v23  ;;  %v8405_v44 = vand.u32 4294901760, %v6373_v29  ;;  %v364_v37 = vand.u32 4294901760, %v363_v49  ;;  %v8586_v49 = vld [vmem:[#allocation7_spill] sm:$0xff] }
  0x30   :  { %4817 = vmatprep.subr.mxu1 %v469_v56  ;;  %v476_v50 = vand.u32 4294901760, %v475_v7  ;;  %4828 = vmatprep.subr.mxu0 %v5927_v25  ;;  %v8585_v7 = vld [vmem:[#allocation6_spill] sm:$0xff] }
  0x31   :  { %4818 = vmatpush3.msra.mxu1 %v357_v1  ;;  %v482_v2 = vsub.f32 %v6366_v14, %v8406_v12  ;;  %623 = vmatprep.mubr.f32.mxu0 %v6307_v30  ;;  %v370_v56 = vsub.f32 %v6373_v29, %v8405_v44  ;;  %v8584_v1 = vld [vmem:[#allocation23_spill] sm:$0xff]  ;;  %v8593_v44 = vld [vmem:[#allocation14_spill] sm:$0xff] }
  0x32   :  { %4829 = vmatpush3.msra.mxu0 %v5950_v31  ;;  %4819 = vmatprep.subr.mxu1 %v476_v50  ;;  %v8587_v50 = vld [vmem:[#allocation8_spill] sm:$0xff]  ;;  %v8594_v12 = vld [vmem:[#allocation15_spill] sm:$0xff] }
  0x33   :  { %4830 = vmatprep.subr.mxu0 %v5959_v35  ;;  %4820 = vmatpush3.msra.mxu1 %v364_v37  ;;  %v483_v27 = vand.u32 4294901760, %v482_v2  ;;  %v371_v47 = vand.u32 4294901760, %v370_v56  ;;  %v8588_v37 = vld [vmem:[#allocation9_spill] sm:$0xff]  ;;  %v8589_v2 = vld [vmem:[#allocation10_spill] sm:$0xff]  ;;  %v8590_v56 = vld [vmem:[#allocation11_spill] sm:$0xff]  ;;  %v8609_v35 = vand.u32 4294901760, %v6319_v19 }
  0x34   :  { %4831 = vmatpush3.msra.mxu0 %v5975_v40 }
  0x35   :  { %4821 = vmatprep.subr.mxu1 %v483_v27  ;;  %4832 = vmatprep.subr.mxu0 %v5989_v45  ;;  %v8591_v27 = vld [vmem:[#allocation12_spill] sm:$0xff] }
  0x36   :  { %4822 = vmatpush3.msra.mxu1 %v371_v47  ;;  %4833 = vmatpush3.msra.mxu0 %v6024_v59  ;;  %v8592_v47 = vld [vmem:[#allocation13_spill] sm:$0xff] }
  0x37   :  { %488 = vmatmul.mubr.f32.vlgmr.msra.gmra.mxu1 %v6300_v26  ;;  %4834 = vmatprep.subr.mxu0 %v6039_v0  ;;  %v8597_v26 = vld [vmem:[#allocation18_spill] sm:$0xff] }
  0x38   :  { %4861 = vmatprep.subr.mxu1 %v5861_v3  ;;  %4835 = vmatpush3.msra.mxu0 %v6053_v8 }
  0x39   :  { %4862 = vmatpush3.msra.mxu1 %v5863_v4  ;;  %4836 = vmatprep.subr.mxu0 %v6067_v42 }
  0x3a   :  { %4863 = vmatprep.subr.mxu1 %v5865_v5  ;;  %4837 = vmatpush3.msra.mxu0 %v6079_v48 }
  0x3b   :  { %4864 = vmatpush3.msra.mxu1 %v5876_v9  ;;  %4838 = vmatprep.subr.mxu0 %v6096_v21 }
  0x3c   :  { %4865 = vmatprep.subr.mxu1 %v5878_v10  ;;  %4839 = vmatpush3.msra.mxu0 %v6108_v6 }
  0x3d   :  { %4866 = vmatpush3.msra.mxu1 %v5880_v11  ;;  %4840 = vmatprep.subr.mxu0 %v6135_v55 }
  0x3e   :  { %4867 = vmatprep.subr.mxu1 %v5892_v15  ;;  %4841 = vmatpush3.msra.mxu0 %v6151_v28 }
  0x3f   :  { %4868 = vmatpush3.msra.mxu1 %v5894_v16  ;;  %4842 = vmatprep.subr.mxu0 %v6175_v34 }
  0x40   :  { %4869 = vmatprep.subr.mxu1 %v5896_v17  ;;  %4843 = vmatpush3.msra.mxu0 %v6191_v46 }
  0x41   :  { %4870 = vmatpush3.msra.mxu1 %v5918_v22  ;;  %4844 = vmatprep.subr.mxu0 %v6203_v43 }
  0x42   :  { %4871 = vmatprep.subr.mxu1 %v5924_v24  ;;  %4845 = vmatpush3.msra.mxu0 %v8582_v33 }
  0x43   :  { %4872 = vmatpush3.msra.mxu1 %v8583_v20  ;;  %4846 = vmatprep.subr.mxu0 %v8584_v1 }
  0x44   :  { %4873 = vmatprep.subr.mxu1 %v8585_v7  ;;  %4847 = vmatpush3.msra.mxu0 %v6246_v60 }
  0x45   :  { %4874 = vmatpush3.msra.mxu1 %v8586_v49  ;;  %4848 = vmatprep.subr.mxu0 %v6271_v53 }
  0x46   :  { %4875 = vmatprep.subr.mxu1 %v8587_v50  ;;  %4849 = vmatpush3.msra.mxu0 %v6285_v36 }
  0x47   :  { %4876 = vmatpush3.msra.mxu1 %v8588_v37  ;;  %4850 = vmatprep.subr.mxu0 %v6298_v57 }
  0x48   :  { %4877 = vmatprep.subr.mxu1 %v8589_v2  ;;  %4851 = vmatpush3.msra.mxu0 %v6311_v32 }
  0x49   :  { %4878 = vmatpush3.msra.mxu1 %v8590_v56  ;;  %4852 = vmatprep.subr.mxu0 %v6323_v13 }
  0x4a   :  { %4879 = vmatprep.subr.mxu1 %v8591_v27  ;;  %4853 = vmatpush3.msra.mxu0 %v6330_v61 }
  0x4b   :  { %4880 = vmatpush3.msra.mxu1 %v8592_v47  ;;  %4854 = vmatprep.subr.mxu0 %v6347_v41 }
  0x4c   :  { %4881 = vmatprep.subr.mxu1 %v8593_v44  ;;  %4855 = vmatpush3.msra.mxu0 %v6357_v51  ;;  %v8598_v51 = vand.u32 4294901760, %v5921_v23  ;;  %v8605_v23 = vand.u32 4294901760, %v5975_v40  ;;  %v8611_v40 = vand.u32 4294901760, %v6053_v8  ;;  %v8617_v8 = vand.u32 4294901760, %v6151_v28 }
  0x4d   :  { %4882 = vmatpush3.msra.mxu1 %v8594_v12  ;;  %4856 = vmatprep.subr.mxu0 %v6366_v14  ;;  %v8599_v12 = vld [vmem:[#allocation19_spill] sm:$0xff]  ;;  %v8603_v14 = vld [vmem:[#allocation22_spill] sm:$0xff] }
  0x4e   :  { %4883 = vmatprep.subr.mxu1 %v8595_v62  ;;  %4857 = vmatpush3.msra.mxu0 %v6373_v29  ;;  %v8600_v62 = vand.u32 4294901760, %v5927_v25  ;;  %v8601_v29 = vld [vmem:[#allocation20_spill] sm:$0xff]  ;;  %v8606_v25 = vand.u32 4294901760, %v5989_v45  ;;  %v8612_v45 = vand.u32 4294901760, %v6067_v42 }
  0x4f   :  { %4884 = vmatpush3.msra.mxu1 %v6147_v63  ;;  %626 = vmatmul.mubr.f32.vlgmr.msra.gmra.mxu0 %v6319_v19  ;;  %v8602_v63 = vand.u32 4294901760, %v5950_v31  ;;  %v8607_v31 = vand.u32 4294901760, %v6307_v30  ;;  %v8623_v30 = vand.u32 4294901760, %v8584_v1 }
  0x50   :  { %4885 = vmatprep.subr.mxu1 %v6164_v39  ;;  %4896 = vmatprep.subr.mxu0 %v8596_v54  ;;  %v8625_v54 = vand.u32 4294901760, %v6246_v60 }
  0x51   :  { %4886 = vmatpush3.msra.mxu1 %v8597_v26  ;;  %4897 = vmatpush3.msra.mxu0 %v8598_v51  ;;  %v8610_v51 = vand.u32 4294901760, %v6039_v0  ;;  %v8614_v0 = vand.u32 4294901760, %v6096_v21  ;;  %v8619_v21 = vand.u32 4294901760, %v6191_v46 }
  0x52   :  { %4887 = vmatprep.subr.mxu1 %v8599_v12  ;;  %4898 = vmatprep.subr.mxu0 %v8600_v62 }
  0x53   :  { %4888 = vmatpush3.msra.mxu1 %v8601_v29  ;;  %4899 = vmatpush3.msra.mxu0 %v8602_v63  ;;  %v8608_v63 = vand.u32 4294901760, %v6024_v59  ;;  %v8613_v59 = vand.u32 4294901760, %v6079_v48  ;;  %v85_v48 = vld [vmem:[%s8337_s1 + $0x168] sm:$0xff] }
  0x54   :  { %4889 = vmatprep.subr.mxu1 %v8603_v14  ;;  %4900 = vmatprep.subr.mxu0 %v8604_v18  ;;  %v6534_v46 = vand.u32 4294901760, %v85_v48  ;;  %v8629_v18 = vand.u32 4294901760, %v6298_v57 }
  0x55   :  { %4890 = vmatpush3.msra.mxu1 %v6242_v38  ;;  %4901 = vmatpush3.msra.mxu0 %v8605_v23  ;;  %v82_v23 = vld [vmem:[%s8337_s1 + $0x150] sm:$0xff] }
  0x56   :  { %4891 = vmatprep.subr.mxu1 %v6259_v52  ;;  %4902 = vmatprep.subr.mxu0 %v8606_v25  ;;  %8622 = vst [vmem:[#allocation21_spill] sm:$0xff] %v6534_v46  ;;  %v6568_v60 = vsub.f32 %v85_v48, %v6534_v46  ;;  %v8644_v48 = vld [vmem:[#allocation16_spill] sm:$0xff] }
  0x57   :  { %4892 = vmatpush3.msra.mxu1 %v6281_v58  ;;  %730 = vmatprep.mubr.f32.mxu1 %v8607_v31  ;;  %v8630_v31 = vand.u32 4294901760, %v6311_v32 }
  0x58   :  { %4903 = vmatpush3.msra.mxu0 %v8608_v63  ;;  %734 = vmatmul.mubr.f32.vlgmr.msra.gmra.mxu1 %v8609_v35  ;;  %v8632_v35 = vand.u32 4294901760, %v6323_v13  ;;  %v81_v13 = vld [vmem:[%s8337_s1 + $0x148] sm:$0xff] }
  0x59   :  { %4904 = vmatprep.subr.mxu0 %v8610_v51  ;;  %4931 = vmatprep.subr.mxu1 %v5861_v3  ;;  %v8615_v3 = vand.u32 4294901760, %v6108_v6  ;;  %v8621_v6 = vand.u32 4294901760, %v8582_v33  ;;  %v8626_v33 = vand.u32 4294901760, %v6271_v53  ;;  %v99_v53 = vld [vmem:[%s8337_s1 + $0x1d8] sm:$0xff] }
  0x5a   :  { %4905 = vmatpush3.msra.mxu0 %v8611_v40  ;;  %4932 = vmatpush3.msra.mxu1 %v5863_v4  ;;  %v103_v4 = vld [vmem:[%s8337_s1 + $0x1f8] sm:$0xff]  ;;  %v6605_v32 = vand.u32 4294901760, %v99_v53 }
  0x5b   :  { %4906 = vmatprep.subr.mxu0 %v8612_v45  ;;  %4933 = vmatprep.subr.mxu1 %v5865_v5  ;;  %v87_v5 = vld [vmem:[%s8337_s1 + $0x178] sm:$0xff]  ;;  %v6508_v42 = vand.u32 4294901760, %v103_v4 }
  0x5c   :  { %4907 = vmatpush3.msra.mxu0 %v8613_v59  ;;  %4934 = vmatpush3.msra.mxu1 %v5876_v9  ;;  %v8616_v9 = vand.u32 4294901760, %v6135_v55  ;;  %v6510_v55 = vand.u32 4294901760, %v87_v5  ;;  %8633 = vst [vmem:[#allocation7_spill] sm:$0xff] %v6605_v32  ;;  %v6613_v59 = vand.u32 4294901760, %v82_v23 }
  0x5d   :  { %4908 = vmatprep.subr.mxu0 %v8614_v0  ;;  %4935 = vmatprep.subr.mxu1 %v5878_v10  ;;  %v86_v10 = vld [vmem:[%s8337_s1 + $0x170] sm:$0xff]  ;;  %v6548_v19 = vsub.f32 %v103_v4, %v6508_v42  ;;  %v8637_v0 = vand.u32 4294901760, %v6347_v41  ;;  %v97_v4 = vld [vmem:[%s8337_s1 + $0x1c8] sm:$0xff] }
  0x5e   :  { %4909 = vmatpush3.msra.mxu0 %v8615_v3  ;;  %4936 = vmatpush3.msra.mxu1 %v5880_v11  ;;  %v8618_v11 = vand.u32 4294901760, %v6175_v34  ;;  %v8620_v34 = vand.u32 4294901760, %v6203_v43  ;;  %8636 = vst [vmem:[#allocation9_spill] sm:$0xff] %v6613_v59 }
  0x5f   :  { %4910 = vmatprep.subr.mxu0 %v8616_v9  ;;  %4937 = vmatprep.subr.mxu1 %v5892_v15  ;;  %v102_v15 = vld [vmem:[%s8337_s1 + $0x1f0] sm:$0xff]  ;;  %v8641_v9 = vld [vmem:[#allocation15_spill] sm:$0xff] }
  0x60   :  { %4911 = vmatpush3.msra.mxu0 %v8617_v8  ;;  %4938 = vmatpush3.msra.mxu1 %v5894_v16  ;;  %v6521_v16 = vand.u32 4294901760, %v86_v10  ;;  %v6532_v28 = vand.u32 4294901760, %v102_v15 }
  0x61   :  { %4912 = vmatprep.subr.mxu0 %v8618_v11  ;;  %4939 = vmatprep.subr.mxu1 %v5896_v17  ;;  %v101_v17 = vld [vmem:[%s8337_s1 + $0x1e8] sm:$0xff]  ;;  %v8642_v11 = vld [vmem:[#allocation27_spill] sm:$0xff] }
  0x62   :  { %4913 = vmatpush3.msra.mxu0 %v8619_v21  ;;  %4940 = vmatpush3.msra.mxu1 %v5918_v22  ;;  %v84_v22 = vld [vmem:[%s8337_s1 + $0x160] sm:$0xff]  ;;  %v6545_v43 = vand.u32 4294901760, %v101_v17  ;;  %v6554_v62 = vsub.f32 %v86_v10, %v6521_v16 }
  0x63   :  { %4914 = vmatprep.subr.mxu0 %v8620_v34  ;;  %4941 = vmatprep.subr.mxu1 %v5924_v24  ;;  %v6543_v24 = vsub.f32 %v87_v5, %v6510_v55  ;;  %v6562_v1 = vand.u32 4294901760, %v84_v22  ;;  %v8639_v5 = vld [vmem:[#allocation26_spill] sm:$0xff]  ;;  %v96_v34 = vld [vmem:[%s8337_s1 + $0x1c0] sm:$0xff] }
  0x64   :  { %4915 = vmatpush3.msra.mxu0 %v8621_v6  ;;  %4942 = vmatpush3.msra.mxu1 %v8583_v20  ;;  %8624 = vst [vmem:[#allocation5_spill] sm:$0xff] %v6545_v43  ;;  %v100_v20 = vld [vmem:[%s8337_s1 + $0x1e0] sm:$0xff]  ;;  %v6588_v25 = vsub.f32 %v101_v17, %v6545_v43  ;;  %v8418_v63 = vand.u32 4294901760, %v6554_v62  ;;  %v6655_v17 = vand.u32 4294901760, %v81_v13 }
  0x65   :  { %4916 = vmatprep.subr.mxu0 %v8623_v30  ;;  %4943 = vmatprep.subr.mxu1 %v8585_v7  ;;  %8627 = vst [vmem:[#allocation23_spill] sm:$0xff] %v6562_v1  ;;  %v8628_v7 = vand.u32 4294901760, %v6285_v36  ;;  %v8421_v36 = vand.u32 4294901760, %v6548_v19  ;;  %v6593_v57 = vand.u32 4294901760, %v100_v20  ;;  %v6603_v51 = vsub.f32 %v84_v22, %v6562_v1  ;;  %v80_v6 = vld [vmem:[%s8337_s1 + $0x140] sm:$0xff] }
  0x66   :  { %4917 = vmatpush3.msra.mxu0 %v8625_v54  ;;  %4944 = vmatpush3.msra.mxu1 %v8586_v49  ;;  %v83_v49 = vld [vmem:[%s8337_s1 + $0x158] sm:$0xff]  ;;  %v8417_v41 = vand.u32 4294901760, %v6588_v25  ;;  %v6644_v10 = vsub.f32 %v6554_v62, %v8418_v63  ;;  %8645 = vst [vmem:[#allocation11_spill] sm:$0xff] %v6655_v17  ;;  %v6665_v30 = vsub.f32 %v99_v53, %v6605_v32  ;;  %v8646_v54 = vld [vmem:[#allocation28_spill] sm:$0xff] }
  0x67   :  { %4918 = vmatprep.subr.mxu0 %v8626_v33  ;;  %4945 = vmatprep.subr.mxu1 %v8587_v50  ;;  %v6577_v50 = vsub.f32 %v102_v15, %v6532_v28  ;;  %8631 = vst [vmem:[#allocation6_spill] sm:$0xff] %v6593_v57  ;;  %v6607_v40 = vand.u32 4294901760, %v83_v49  ;;  %v6647_v8 = vsub.f32 %v100_v20, %v6593_v57  ;;  %v8643_v15 = vand.u32 4294901760, %v8642_v11  ;;  %v8648_v20 = vld [vmem:[#allocation24_spill] sm:$0xff] }
  0x68   :  { %4919 = vmatpush3.msra.mxu0 %v8628_v7  ;;  %4946 = vmatpush3.msra.mxu1 %v8588_v37  ;;  %v8420_v37 = vand.u32 4294901760, %v6543_v24  ;;  %v8416_v22 = vand.u32 4294901760, %v6603_v51  ;;  %v8647_v33 = vand.u32 4294901760, %v8646_v54 }
  0x69   :  { %4920 = vmatprep.subr.mxu0 %v8629_v18  ;;  %4947 = vmatprep.subr.mxu1 %v8589_v2  ;;  %v98_v2 = vld [vmem:[%s8337_s1 + $0x1d0] sm:$0xff]  ;;  %8634 = vst [vmem:[#allocation8_spill] sm:$0xff] %v6607_v40  ;;  %v8419_v45 = vand.u32 4294901760, %v6577_v50  ;;  %v6653_v21 = vsub.f32 %v83_v49, %v6607_v40  ;;  %v6676_v49 = vsub.f32 %v82_v23, %v6613_v59  ;;  %v6678_v18 = vand.u32 4294901760, %v97_v4 }
  0x6a   :  { %4921 = vmatpush3.msra.mxu0 %v8630_v31  ;;  %4948 = vmatpush3.msra.mxu1 %v8590_v56  ;;  %v8635_v56 = vand.u32 4294901760, %v6330_v61  ;;  %v6625_v61 = vsub.f32 %v6548_v19, %v8421_v36  ;;  %v6632_v3 = vand.u32 4294901760, %v98_v2  ;;  %v8650_v31 = vld [vmem:[#allocation17_spill] sm:$0xff]  ;;  %v6692_v23 = vsub.f32 %v6588_v25, %v8417_v41 }
  0x6b   :  { %4922 = vmatprep.subr.mxu0 %v8632_v35  ;;  %4949 = vmatprep.subr.mxu1 %v8591_v27  ;;  %v8415_v27 = vand.u32 4294901760, %v6568_v60  ;;  %v6673_v7 = vsub.f32 %v6577_v50, %v8419_v45  ;;  %8649 = vst [vmem:[#allocation12_spill] sm:$0xff] %v6678_v18  ;;  %v8651_v35 = vld [vmem:[#allocation25_spill] sm:$0xff]  ;;  %v8422_v11 = vand.u32 4294901760, %v6647_v8  ;;  %v6719_v54 = vsub.f32 %v6603_v51, %v8416_v22  ;;  %v6733_v22 = vld [vmem:[%s8337_s1 + $0x1b0] sm:$0xff] }
  0x6c   :  { %4923 = vmatpush3.msra.mxu0 %v8635_v56  ;;  %4950 = vmatpush3.msra.mxu1 %v8592_v47  ;;  %v6630_v47 = vsub.f32 %v6543_v24, %v8420_v37  ;;  %8638 = vst [vmem:[#allocation10_spill] sm:$0xff] %v6632_v3  ;;  %v8425_v41 = vand.u32 4294901760, %v6676_v49  ;;  %v6737_v63 = vsub.f32 %v97_v4, %v6678_v18  ;;  %v77_v36 = vld [vmem:[%s8337_s1 + $0x128] sm:$0xff] }
  0x6d   :  { %4924 = vmatprep.subr.mxu0 %v8637_v0  ;;  %4951 = vmatprep.subr.mxu1 %v8593_v44  ;;  %v8640_v44 = vand.u32 4294901760, %v8639_v5  ;;  %v6683_v53 = vsub.f32 %v6568_v60, %v8415_v27  ;;  %v6695_v5 = vsub.f32 %v98_v2, %v6632_v3  ;;  %v79_v2 = vld [vmem:[%s8337_s1 + $0x138] sm:$0xff]  ;;  %v78_v27 = vld [vmem:[%s8337_s1 + $0x130] sm:$0xff] }
  0x6e   :  { %4952 = vmatpush3.msra.mxu1 %v8641_v9  ;;  %900 = vmatprep.mubr.f32.mxu0 %v8648_v20  ;;  %v6700_v9 = vand.u32 4294901760, %v96_v34 }
  0x6f   :  { %4925 = vmatpush3.msra.mxu0 %v8640_v44  ;;  %4953 = vmatprep.subr.mxu1 %v8644_v48  ;;  %v95_v48 = vld [vmem:[%s8337_s1 + $0x1b8] sm:$0xff]  ;;  %v8428_v37 = vand.u32 4294901760, %v6695_v5  ;;  %v76_v44 = vld [vmem:[%s8337_s1 + $0x120] sm:$0xff] }
  0x70   :  { %4926 = vmatprep.subr.mxu0 %v8643_v15  ;;  %4954 = vmatpush3.msra.mxu1 %v8650_v31  ;;  %8652 = vst [vmem:[#allocation13_spill] sm:$0xff] %v6700_v9  ;;  %v6703_v15 = vand.u32 4294901760, %v80_v6  ;;  %v8424_v31 = vand.u32 4294901760, %v6653_v21  ;;  %v6742_v45 = vand.u32 4294901760, %v95_v48 }
  0x71   :  { %4927 = vmatpush3.msra.mxu0 %v8647_v33  ;;  %4955 = vmatprep.subr.mxu1 %v6164_v39  ;;  %v6714_v39 = vsub.f32 %v81_v13, %v6655_v17  ;;  %v8423_v33 = vand.u32 4294901760, %v6665_v30  ;;  %v6760_v13 = vand.u32 4294901760, %v78_v27  ;;  %v6809_v56 = vsub.f32 %v6695_v5, %v8428_v37 }
  0x72   :  { %902 = vmatmul.mubr.f32.vlgmr.msra.gmra.mxu0 %v8651_v35  ;;  %4966 = vmatprep.subr.mxu0 %v6508_v42  ;;  %8653 = vst [vmem:[#allocation14_spill] sm:$0xff] %v6703_v15  ;;  %8655 = vst [vmem:[#allocation19_spill] sm:$0xff] %v6742_v45  ;;  %v6758_v4 = vsub.f32 %v80_v6, %v6703_v15  ;;  %v6814_v0 = vsub.f32 %v95_v48, %v6742_v45  ;;  %v8664_v37 = vand.u32 4294901760, %v6625_v61 }
  0x73   :  { %4956 = vmatpush3.msra.mxu1 %v8597_v26  ;;  %4967 = vmatpush3.msra.mxu0 %v6510_v55  ;;  %8654 = vst [vmem:[#allocation18_spill] sm:$0xff] %v6714_v39  ;;  %v1247_v26 = vand.u32 4294901760, %v6673_v7  ;;  %v6744_v7 = vand.u32 4294901760, %v79_v2  ;;  %8658 = vst [vmem:[#allocation26_spill] sm:$0xff] %v6760_v13  ;;  %v6774_v6 = vsub.f32 %v6665_v30, %v8423_v33  ;;  %v93_v33 = vld [vmem:[%s8337_s1 + $0x1a8] sm:$0xff] }
  0x74   :  { %4957 = vmatprep.subr.mxu1 %v8599_v12  ;;  %4968 = vmatprep.subr.mxu0 %v6532_v28  ;;  %8657 = vst [vmem:[#allocation22_spill] sm:$0xff] %v6758_v4  ;;  %v6763_v12 = vsub.f32 %v96_v34, %v6700_v9  ;;  %v6779_v34 = vsub.f32 %v6653_v21, %v8424_v31  ;;  %v6795_v31 = vand.u32 4294901760, %v77_v36 }
  0x75   :  { %4958 = vmatpush3.msra.mxu1 %v8601_v29  ;;  %4969 = vmatpush3.msra.mxu0 %v6521_v16  ;;  %8656 = vst [vmem:[#allocation20_spill] sm:$0xff] %v6744_v7  ;;  %v6755_v29 = vsub.f32 %v6647_v8, %v8422_v11  ;;  %v6782_v11 = vand.u32 4294901760, %v6733_v22  ;;  %v1268_v48 = vand.u32 4294901760, %v6774_v6  ;;  %v8667_v6 = vand.u32 4294901760, %v6737_v63 }
  0x76   :  { %4959 = vmatprep.subr.mxu1 %v8603_v14  ;;  %4970 = vmatprep.subr.mxu0 %v6545_v43  ;;  %8659 = vst [vmem:[#allocation15_spill] sm:$0xff] %v6763_v12  ;;  %8661 = vst [vmem:[#allocation16_spill] sm:$0xff] %v6795_v31  ;;  %v6811_v14 = vand.u32 4294901760, %v76_v44 }
  0x77   :  { %4960 = vmatpush3.msra.mxu1 %v6242_v38  ;;  %4971 = vmatpush3.msra.mxu0 %v6534_v46  ;;  %8660 = vst [vmem:[#allocation27_spill] sm:$0xff] %v6782_v11  ;;  %v6789_v38 = vsub.f32 %v6676_v49, %v8425_v41  ;;  %v6804_v41 = vsub.f32 %v79_v2, %v6744_v7  ;;  %v6829_v46 = vand.u32 4294901760, %v93_v33  ;;  %v8668_v2 = vand.u32 4294901760, %v6714_v39 }
  0x78   :  { %4961 = vmatprep.subr.mxu1 %v6259_v52  ;;  %4972 = vmatprep.subr.mxu0 %v6593_v57  ;;  %v92_v52 = vld [vmem:[%s8337_s1 + $0x1a0] sm:$0xff]  ;;  %8662 = vst [vmem:[#allocation28_spill] sm:$0xff] %v6811_v14  ;;  %v6849_v57 = vsub.f32 %v77_v36, %v6795_v31  ;;  %v6865_v36 = vsub.f32 %v76_v44, %v6811_v14 }
  0x79   :  { %4962 = vmatpush3.msra.mxu1 %v6281_v58  ;;  %1004 = vmatprep.mubr.f32.mxu1 %v8648_v20  ;;  %v1261_v58 = vand.u32 4294901760, %v6755_v29  ;;  %v6820_v20 = vsub.f32 %v78_v27, %v6760_v13  ;;  %8665 = vst [vmem:[#allocation17_spill] sm:$0xff] %v6829_v46  ;;  %v75_v27 = vld [vmem:[%s8337_s1 + $0x118] sm:$0xff] }
  0x7a   :  { %4973 = vmatpush3.msra.mxu0 %v6562_v1  ;;  %1006 = vmatmul.mubr.f32.vlgmr.msra.gmra.mxu1 %v8651_v35  ;;  %v1156_v1 = vand.u32 4294901760, %v6779_v34  ;;  %v6831_v35 = vand.u32 4294901760, %v92_v52  ;;  %v36_v29 = vld [vmem:[%s8336_s0 + $0x18] sm:$0xff]  ;;  %v6846_v34 = vsub.f32 %v6737_v63, %v8667_v6  ;;  %v1275_v6 = vand.u32 4294901760, %v6809_v56  ;;  %8669 = vst [vmem:[#allocation25_spill] sm:$0xff] %v6865_v36 }
  0x7b   :  { %8663 = vst [vmem:[#allocation24_spill] sm:$0xff] %v6820_v20  ;;  %4974 = vmatprep.subr.mxu0 %v6605_v32  ;;  %5001 = vmatprep.subr.mxu1 %v8664_v37  ;;  %v8666_v37 = vand.u32 4294901760, %v6630_v47  ;;  %v6854_v32 = vsub.f32 %v6714_v39, %v8668_v2  ;;  %v74_v47 = vld [vmem:[%s8337_s1 + $0x110] sm:$0xff]  ;;  %v91_v2 = vld [vmem:[%s8337_s1 + $0x198] sm:$0xff]  ;;  %v8671_v56 = vand.u32 4294901760, %v6763_v12  ;;  %v6888_v61 = vand.u32 4294901760, %v75_v27 }
  0x7c   :  { %4975 = vmatpush3.msra.mxu0 %v6607_v40  ;;  %v6873_v40 = vsub.f32 %v6733_v22, %v6782_v11  ;;  %v90_v22 = vld [vmem:[%s8337_s1 + $0x190] sm:$0xff]  ;;  %v1282_v43 = vand.u32 4294901760, %v6846_v34 }
  0x7d   :  { %5002 = vmatpush3.msra.mxu1 %v8666_v37  ;;  %v35_v37 = vld [vmem:[%s8336_s0 + $0x10] sm:$0xff]  ;;  %4976 = vmatprep.subr.mxu0 %v6632_v3  ;;  %v8670_v3 = vand.u32 4294901760, %v6644_v10  ;;  %v6881_v44 = vsub.f32 %v6763_v12, %v8671_v56  ;;  %v6899_v56 = vand.u32 4294901760, %v74_v47  ;;  %v8676_v12 = vand.u32 4294901760, %v6683_v53  ;;  %v73_v53 = vld [vmem:[%s8337_s1 + $0x108] sm:$0xff] }
  0x7e   :  { %5003 = vmatprep.subr.mxu1 %v1247_v26  ;;  %4977 = vmatpush3.msra.mxu0 %v6613_v59  ;;  %v8672_v26 = vand.u32 4294901760, %v6758_v4  ;;  %v6893_v59 = vand.u32 4294901760, %v36_v29 }
  0x7f   :  { %5004 = vmatpush3.msra.mxu1 %v8670_v3  ;;  %4978 = vmatprep.subr.mxu0 %v6678_v18  ;;  %v8674_v3 = vand.u32 4294901760, %v6692_v23  ;;  %v1170_v18 = vand.u32 4294901760, %v6854_v32  ;;  %v6911_v23 = vand.u32 4294901760, %v91_v2  ;;  %v89_v32 = vld [vmem:[%s8337_s1 + $0x188] sm:$0xff]  ;;  %v1289_v34 = vand.u32 4294901760, %v6881_v44 }
  0x80   :  { %v6886_v39 = vsub.f32 %v6758_v4, %v8672_v26  ;;  %8673 = vst [vmem:[#allocation29_spill] sm:$0xff] %v6893_v59  ;;  %v6902_v26 = vsub.f32 %v93_v33, %v6829_v46  ;;  %v6904_v4 = vand.u32 4294901760, %v35_v37  ;;  %4979 = vmatpush3.msra.mxu0 %v6655_v17  ;;  %v8677_v33 = vand.u32 4294901760, %v6814_v0  ;;  %1348 = vmatprep.mubr.f32.mxu1 %v6893_v59 }
  0x81   :  { %5005 = vmatprep.subr.mxu1 %v8674_v3  ;;  %4980 = vmatprep.subr.mxu0 %v6700_v9  ;;  %v6920_v17 = vand.u32 4294901760, %v90_v22  ;;  %v6935_v3 = vsub.f32 %v75_v27, %v6888_v61  ;;  %v6941_v9 = vsub.f32 %v36_v29, %v6893_v59  ;;  %v6948_v44 = vsub.f32 %v74_v47, %v6899_v56  ;;  %v88_v27 = vld [vmem:[%s8337_s1 + $0x180] sm:$0xff]  ;;  %v8716_v59 = vld [vmem:[#allocation26_spill] sm:$0xff] }
  0x82   :  { %8675 = vst [vmem:[#allocation30_spill] sm:$0xff] %v6904_v4  ;;  %5006 = vmatpush3.msra.mxu1 %v8676_v12  ;;  %v6918_v10 = vsub.f32 %v6814_v0, %v8677_v33  ;;  %v6927_v12 = vsub.f32 %v92_v52, %v6831_v35  ;;  %4981 = vmatpush3.msra.mxu0 %v6703_v15  ;;  %v1177_v33 = vand.u32 4294901760, %v6886_v39  ;;  %v72_v29 = vld [vmem:[%s8337_s1 + $0x100] sm:$0xff]  ;;  %v8682_v15 = vand.u32 4294901760, %v6873_v40 }
  0x83   :  { %5007 = vmatprep.subr.mxu1 %v1261_v58  ;;  %8678 = vst [vmem:[#allocation31_spill] sm:$0xff] %v6920_v17  ;;  %v8679_v58 = vand.u32 4294901760, %v6719_v54  ;;  %4982 = vmatprep.subr.mxu0 %v6742_v45  ;;  %v8680_v54 = vand.u32 4294901760, %v6804_v41  ;;  %v6968_v45 = vsub.f32 %v91_v2, %v6911_v23  ;;  %v8683_v39 = vand.u32 4294901760, %v6789_v38 }
  0x84   :  { %4983 = vmatpush3.msra.mxu0 %v6744_v7  ;;  %v6975_v7 = vand.u32 4294901760, %v73_v53  ;;  %v6981_v2 = vand.u32 4294901760, %v88_v27  ;;  %v8469_v38 = vand.u32 4294901760, %v6865_v36 }
  0x85   :  { %5008 = vmatpush3.msra.mxu1 %v8679_v58  ;;  %v1183_v52 = vsub.f32 %v6804_v41, %v8680_v54  ;;  %v6958_v58 = vsub.f32 %v35_v37, %v6904_v4  ;;  %v6964_v54 = vand.u32 4294901760, %v89_v32  ;;  %4984 = vmatprep.subr.mxu0 %v6782_v11  ;;  %v1296_v37 = vand.u32 4294901760, %v6918_v10 }
  0x86   :  { %5009 = vmatprep.subr.mxu1 %v1268_v48  ;;  %v8681_v48 = vand.u32 4294901760, %v6820_v20  ;;  %4985 = vmatpush3.msra.mxu0 %v6760_v13  ;;  %v6987_v10 = vsub.f32 %v90_v22, %v6920_v17 }
  0x87   :  { %5010 = vmatpush3.msra.mxu1 %v1156_v1  ;;  %v1302_v1 = vsub.f32 %v6873_v40, %v8682_v15  ;;  %4986 = vmatprep.subr.mxu0 %v6829_v46  ;;  %v1184_v15 = vand.u32 4294901760, %v1183_v52 }
  0x88   :  { %v1190_v47 = vsub.f32 %v6820_v20, %v8681_v48  ;;  %5011 = vmatprep.subr.mxu1 %v1275_v6  ;;  %v6983_v20 = vand.u32 4294901760, %v72_v29  ;;  %v8684_v48 = vand.u32 4294901760, %v6902_v26  ;;  %4987 = vmatpush3.msra.mxu0 %v6795_v31  ;;  %v8685_v6 = vand.u32 4294901760, %v6849_v57 }
  0x89   :  { %5012 = vmatpush3.msra.mxu1 %v8683_v39  ;;  %4988 = vmatprep.subr.mxu0 %v6831_v35  ;;  %v1303_v52 = vand.u32 4294901760, %v1302_v1  ;;  %v8686_v39 = vand.u32 4294901760, %v6927_v12 }
  0x8a   :  { %5013 = vmatprep.subr.mxu1 %v1282_v43  ;;  %v1309_v13 = vsub.f32 %v6902_v26, %v8684_v48  ;;  %v1191_v11 = vand.u32 4294901760, %v1190_v47  ;;  %v1197_v22 = vsub.f32 %v6849_v57, %v8685_v6  ;;  %v7001_v43 = vsub.f32 %v89_v32, %v6964_v54  ;;  %4989 = vmatpush3.msra.mxu0 %v6811_v14 }
  0x8b   :  { %5014 = vmatpush3.msra.mxu1 %v1170_v18  ;;  %v7005_v48 = vsub.f32 %v73_v53, %v6975_v7  ;;  %v1316_v18 = vsub.f32 %v6927_v12, %v8686_v39  ;;  %v7013_v6 = vsub.f32 %v72_v29, %v6983_v20  ;;  %v8688_v32 = vand.u32 4294901760, %v6941_v9  ;;  %4990 = vmatprep.subr.mxu0 %v6911_v23 }
  0x8c   :  { %5015 = vmatprep.subr.mxu1 %v1289_v34  ;;  %v7020_v53 = vsub.f32 %v88_v27, %v6981_v2  ;;  %v1310_v39 = vand.u32 4294901760, %v1309_v13  ;;  %v8690_v29 = vand.u32 4294901760, %v6958_v58  ;;  %4991 = vmatpush3.msra.mxu0 %v6888_v61  ;;  %v8691_v27 = vand.u32 4294901760, %v6968_v45 }
  0x8d   :  { %5016 = vmatpush3.msra.mxu1 %v1177_v33  ;;  %8687 = vst [vmem:[#allocation32_spill] sm:$0xff] %v7013_v6  ;;  %v1110_v34 = vsub.f32 %v6941_v9, %v8688_v32  ;;  %v1204_v33 = vsub.f32 %v6865_v36, %v8469_v38  ;;  %v1198_v32 = vand.u32 4294901760, %v1197_v22  ;;  %4992 = vmatprep.subr.mxu0 %v6920_v17  ;;  %v8692_v38 = vand.u32 4294901760, %v6935_v3 }
  0x8e   :  { %8689 = vst [vmem:[#allocation33_spill] sm:$0xff] %v7020_v53  ;;  %5017 = vmatprep.subr.mxu1 %v1296_v37  ;;  %v1116_v47 = vsub.f32 %v6958_v58, %v8690_v29  ;;  %v1323_v1 = vsub.f32 %v6968_v45, %v8691_v27  ;;  %v1317_v37 = vand.u32 4294901760, %v1316_v18  ;;  %4993 = vmatpush3.msra.mxu0 %v6899_v56  ;;  %v8693_v22 = vand.u32 4294901760, %v6987_v10 }
  0x8f   :  { %5018 = vmatpush3.msra.mxu1 %v1184_v15  ;;  %v1211_v29 = vsub.f32 %v6935_v3, %v8692_v38  ;;  %v1111_v15 = vand.u32 4294901760, %v1110_v34  ;;  %v8473_v13 = vand.u32 4294901760, %v7020_v53  ;;  %4994 = vmatprep.subr.mxu0 %v6964_v54  ;;  %v8694_v17 = vand.u32 4294901760, %v6948_v44 }
  0x90   :  { %5019 = vmatprep.subr.mxu1 %v1303_v52  ;;  %v1330_v27 = vsub.f32 %v6987_v10, %v8693_v22  ;;  %v1205_v52 = vand.u32 4294901760, %v1204_v33  ;;  %v1117_v18 = vand.u32 4294901760, %v1116_v47  ;;  %v8472_v46 = vand.u32 4294901760, %v7013_v6  ;;  %4995 = vmatpush3.msra.mxu0 %v6975_v7 }
  0x91   :  { %5020 = vmatpush3.msra.mxu1 %v1191_v11  ;;  %v1218_v38 = vsub.f32 %v6948_v44, %v8694_v17  ;;  %v1324_v11 = vand.u32 4294901760, %v1323_v1  ;;  %v8695_v34 = vand.u32 4294901760, %v7001_v43  ;;  %4996 = vmatprep.subr.mxu0 %v6981_v2  ;;  %v8696_v47 = vand.u32 4294901760, %v7005_v48 }
  0x92   :  { %5021 = vmatprep.subr.mxu1 %v1310_v39  ;;  %v1212_v39 = vand.u32 4294901760, %v1211_v29  ;;  %4997 = vmatpush3.msra.mxu0 %v6983_v20  ;;  %v1331_v17 = vand.u32 4294901760, %v1330_v27  ;;  %v1344_v1 = vsub.f32 %v7020_v53, %v8473_v13  ;;  %v8714_v13 = vld [vmem:[#allocation20_spill] sm:$0xff] }
  0x93   :  { %5022 = vmatpush3.msra.mxu1 %v1198_v32  ;;  %v1337_v22 = vsub.f32 %v7001_v43, %v8695_v34  ;;  %v1225_v33 = vsub.f32 %v7005_v48, %v8696_v47  ;;  %1112 = vmatprep.mubr.f32.mxu0 %v1111_v15  ;;  %v1219_v32 = vand.u32 4294901760, %v1218_v38  ;;  %v8698_v38 = vld [vmem:[#allocation18_spill] sm:$0xff]  ;;  %v8700_v34 = vld [vmem:[#allocation15_spill] sm:$0xff] }
  0x94   :  { %5023 = vmatprep.subr.mxu1 %v1317_v37  ;;  %1118 = vmatmul.mubr.f32.vlgmr.msra.gmra.mxu0 %v1117_v18  ;;  %v1232_v37 = vsub.f32 %v7013_v6, %v8472_v46  ;;  %v1345_v27 = vand.u32 4294901760, %v1344_v1  ;;  %v8697_v18 = vld [vmem:[#allocation5_spill] sm:$0xff]  ;;  %v8703_v47 = vld [vmem:[#allocation23_spill] sm:$0xff]  ;;  %v8706_v1 = vld [vmem:[#allocation10_spill] sm:$0xff] }
  0x95   :  { %5024 = vmatpush3.msra.mxu1 %v1205_v52  ;;  %5036 = vmatprep.subr.mxu0 %v6548_v19  ;;  %v1338_v29 = vand.u32 4294901760, %v1337_v22  ;;  %v1226_v15 = vand.u32 4294901760, %v1225_v33  ;;  %v8701_v22 = vld [vmem:[#allocation6_spill] sm:$0xff]  ;;  %v8704_v33 = vld [vmem:[#allocation7_spill] sm:$0xff] }
  0x96   :  { %5025 = vmatprep.subr.mxu1 %v1324_v11  ;;  %5037 = vmatpush3.msra.mxu0 %v6543_v24  ;;  %v1233_v52 = vand.u32 4294901760, %v1232_v37  ;;  %v8699_v11 = vld [vmem:[#allocation21_spill] sm:$0xff]  ;;  %v8713_v46 = vld [vmem:[#allocation19_spill] sm:$0xff] }
  0x97   :  { %5026 = vmatpush3.msra.mxu1 %v1212_v39  ;;  %5038 = vmatprep.subr.mxu0 %v6577_v50  ;;  %v8702_v39 = vld [vmem:[#allocation22_spill] sm:$0xff]  ;;  %v8708_v37 = vld [vmem:[#allocation9_spill] sm:$0xff] }
  0x98   :  { %5027 = vmatprep.subr.mxu1 %v1331_v17  ;;  %5039 = vmatpush3.msra.mxu0 %v6554_v62  ;;  %v8705_v17 = vld [vmem:[#allocation8_spill] sm:$0xff] }
  0x99   :  { %5028 = vmatpush3.msra.mxu1 %v1219_v32  ;;  %5040 = vmatprep.subr.mxu0 %v6588_v25  ;;  %v8707_v32 = vld [vmem:[#allocation24_spill] sm:$0xff] }
  0x9a   :  { %5029 = vmatprep.subr.mxu1 %v1338_v29  ;;  %5041 = vmatpush3.msra.mxu0 %v6568_v60  ;;  %v8709_v29 = vld [vmem:[#allocation12_spill] sm:$0xff] }
  0x9b   :  { %5030 = vmatpush3.msra.mxu1 %v1226_v15  ;;  %5042 = vmatprep.subr.mxu0 %v6647_v8  ;;  %v8710_v15 = vld [vmem:[#allocation11_spill] sm:$0xff] }
  0x9c   :  { %5031 = vmatprep.subr.mxu1 %v1345_v27  ;;  %5043 = vmatpush3.msra.mxu0 %v6603_v51  ;;  %v8711_v27 = vld [vmem:[#allocation13_spill] sm:$0xff] }
  0x9d   :  { %5032 = vmatpush3.msra.mxu1 %v1233_v52  ;;  %5044 = vmatprep.subr.mxu0 %v6665_v30  ;;  %v8712_v52 = vld [vmem:[#allocation14_spill] sm:$0xff] }
  0x9e   :  { %1350 = vmatmul.mubr.f32.vlgmr.msra.gmra.mxu1 %v6904_v4  ;;  %5071 = vmatprep.subr.mxu1 %v6508_v42  ;;  %v8715_v4 = vld [vmem:[#allocation27_spill] sm:$0xff] }
  0x9f   :  { %5045 = vmatpush3.msra.mxu0 %v6653_v21  ;;  %5072 = vmatpush3.msra.mxu1 %v6510_v55 }
  0xa0   :  { %5046 = vmatprep.subr.mxu0 %v6695_v5  ;;  %5073 = vmatprep.subr.mxu1 %v6532_v28 }
  0xa1   :  { %5047 = vmatpush3.msra.mxu0 %v6676_v49  ;;  %5074 = vmatpush3.msra.mxu1 %v6521_v16 }
  0xa2   :  { %5048 = vmatprep.subr.mxu0 %v6737_v63  ;;  %5075 = vmatprep.subr.mxu1 %v8697_v18 }
  0xa3   :  { %5049 = vmatpush3.msra.mxu0 %v8698_v38  ;;  %5076 = vmatpush3.msra.mxu1 %v8699_v11 }
  0xa4   :  { %5050 = vmatprep.subr.mxu0 %v8700_v34  ;;  %5077 = vmatprep.subr.mxu1 %v8701_v22 }
  0xa5   :  { %5051 = vmatpush3.msra.mxu0 %v8702_v39  ;;  %5078 = vmatpush3.msra.mxu1 %v8703_v47 }
  0xa6   :  { %5052 = vmatprep.subr.mxu0 %v6814_v0  ;;  %5079 = vmatprep.subr.mxu1 %v8704_v33 }
  0xa7   :  { %5053 = vmatpush3.msra.mxu0 %v6804_v41  ;;  %5080 = vmatpush3.msra.mxu1 %v8705_v17 }
  0xa8   :  { %5054 = vmatprep.subr.mxu0 %v6873_v40  ;;  %5081 = vmatprep.subr.mxu1 %v8706_v1 }
  0xa9   :  { %5055 = vmatpush3.msra.mxu0 %v8707_v32  ;;  %5082 = vmatpush3.msra.mxu1 %v8708_v37 }
  0xaa   :  { %5056 = vmatprep.subr.mxu0 %v6902_v26  ;;  %5083 = vmatprep.subr.mxu1 %v8709_v29 }
  0xab   :  { %5057 = vmatpush3.msra.mxu0 %v6849_v57  ;;  %5084 = vmatpush3.msra.mxu1 %v8710_v15 }
  0xac   :  { %5058 = vmatprep.subr.mxu0 %v6927_v12  ;;  %5085 = vmatprep.subr.mxu1 %v8711_v27 }
  0xad   :  { %5059 = vmatpush3.msra.mxu0 %v6865_v36  ;;  %5086 = vmatpush3.msra.mxu1 %v8712_v52  ;;  %v8717_v36 = vld [vmem:[#allocation17_spill] sm:$0xff] }
  0xae   :  { %5060 = vmatprep.subr.mxu0 %v6968_v45  ;;  %5087 = vmatprep.subr.mxu1 %v8713_v46 }
  0xaf   :  { %5061 = vmatpush3.msra.mxu0 %v6935_v3  ;;  %5088 = vmatpush3.msra.mxu1 %v8714_v13 }
  0xb0   :  { %5062 = vmatprep.subr.mxu0 %v6987_v10  ;;  %5089 = vmatprep.subr.mxu1 %v8715_v4 }
  0xb1   :  { %5063 = vmatpush3.msra.mxu0 %v6948_v44  ;;  %5090 = vmatpush3.msra.mxu1 %v8716_v59 }
  0xb2   :  { %5064 = vmatprep.subr.mxu0 %v7001_v43  ;;  %5091 = vmatprep.subr.mxu1 %v8717_v36  ;;  %v8718_v36 = vand.u32 4294901760, %v6548_v19  ;;  %v8723_v19 = vand.u32 4294901760, %v6588_v25  ;;  %v8728_v25 = vand.u32 4294901760, %v6958_v58 }
  0xb3   :  { %5065 = vmatpush3.msra.mxu0 %v7005_v48  ;;  %5092 = vmatpush3.msra.mxu1 %v6795_v31  ;;  %v8719_v31 = vand.u32 4294901760, %v6543_v24  ;;  %v8724_v24 = vand.u32 4294901760, %v6568_v60  ;;  %v8730_v60 = vand.u32 4294901760, %v6653_v21 }
  0xb4   :  { %5066 = vmatprep.subr.mxu0 %v7020_v53  ;;  %5093 = vmatprep.subr.mxu1 %v6831_v35  ;;  %v8720_v53 = vld [vmem:[#allocation31_spill] sm:$0xff] }
  0xb5   :  { %5067 = vmatpush3.msra.mxu0 %v7013_v6  ;;  %1485 = vmatprep.mubr.f32.mxu0 %v6941_v9  ;;  %v8721_v6 = vand.u32 4294901760, %v6577_v50  ;;  %v8725_v50 = vand.u32 4294901760, %v6647_v8  ;;  %v8731_v8 = vand.u32 4294901760, %v6695_v5  ;;  %v8737_v5 = vand.u32 4294901760, %v6814_v0 }
  0xb6   :  { %5094 = vmatpush3.msra.mxu1 %v6811_v14  ;;  %1488 = vmatmul.mubr.f32.vlgmr.msra.gmra.mxu0 %v6958_v58  ;;  %v8722_v14 = vand.u32 4294901760, %v6554_v62  ;;  %v8726_v62 = vand.u32 4294901760, %v6941_v9  ;;  %v134_v9 = vld [vmem:[%s8337_s1 + $0x2f0] sm:$0xff]  ;;  %v8739_v0 = vand.u32 4294901760, %v6873_v40  ;;  %v116_v40 = vld [vmem:[%s8337_s1 + $0x260] sm:$0xff] }
  0xb7   :  { %5095 = vmatprep.subr.mxu1 %v6911_v23  ;;  %5106 = vmatprep.subr.mxu0 %v8718_v36  ;;  %v8738_v36 = vand.u32 4294901760, %v6804_v41  ;;  %v117_v41 = vld [vmem:[%s8337_s1 + $0x268] sm:$0xff] }
  0xb8   :  { %5096 = vmatpush3.msra.mxu1 %v6888_v61  ;;  %5107 = vmatpush3.msra.mxu0 %v8719_v31  ;;  %v8727_v31 = vand.u32 4294901760, %v6603_v51  ;;  %v8732_v51 = vand.u32 4294901760, %v6676_v49  ;;  %v118_v49 = vld [vmem:[%s8337_s1 + $0x270] sm:$0xff] }
  0xb9   :  { %5097 = vmatprep.subr.mxu1 %v8720_v53  ;;  %5108 = vmatprep.subr.mxu0 %v8721_v6  ;;  %v133_v6 = vld [vmem:[%s8337_s1 + $0x2e8] sm:$0xff] }
  0xba   :  { %5098 = vmatpush3.msra.mxu1 %v6899_v56  ;;  %5109 = vmatpush3.msra.mxu0 %v8722_v14  ;;  %v8729_v14 = vand.u32 4294901760, %v6665_v30  ;;  %v8733_v30 = vand.u32 4294901760, %v6737_v63  ;;  %v8736_v63 = vand.u32 4294901760, %v8702_v39  ;;  %v7224_v39 = vand.u32 4294901760, %v133_v6 }
  0xbb   :  { %5099 = vmatprep.subr.mxu1 %v6964_v54  ;;  %5110 = vmatprep.subr.mxu0 %v8723_v19 }
  0xbc   :  { %5100 = vmatpush3.msra.mxu1 %v6975_v7  ;;  %5111 = vmatpush3.msra.mxu0 %v8724_v24  ;;  %v8748_v24 = vand.u32 4294901760, %v6968_v45  ;;  %v114_v45 = vld [vmem:[%s8337_s1 + $0x250] sm:$0xff] }
  0xbd   :  { %5101 = vmatprep.subr.mxu1 %v6981_v2  ;;  %5112 = vmatprep.subr.mxu0 %v8725_v50 }
  0xbe   :  { %5102 = vmatpush3.msra.mxu1 %v6983_v20  ;;  %1592 = vmatprep.mubr.f32.mxu1 %v8726_v62  ;;  %v7264_v62 = vsub.f32 %v133_v6, %v7224_v39 }
  0xbf   :  { %5113 = vmatpush3.msra.mxu0 %v8727_v31  ;;  %1596 = vmatmul.mubr.f32.vlgmr.msra.gmra.mxu1 %v8728_v25 }
  0xc0   :  { %5114 = vmatprep.subr.mxu0 %v8729_v14  ;;  %5141 = vmatprep.subr.mxu1 %v6508_v42  ;;  %v119_v42 = vld [vmem:[%s8337_s1 + $0x278] sm:$0xff] }
  0xc1   :  { %5115 = vmatpush3.msra.mxu0 %v8730_v60  ;;  %5142 = vmatpush3.msra.mxu1 %v6510_v55  ;;  %v8734_v55 = vand.u32 4294901760, %v8698_v38  ;;  %v7183_v21 = vand.u32 4294901760, %v119_v42  ;;  %v8740_v38 = vand.u32 4294901760, %v8707_v32 }
  0xc2   :  { %5116 = vmatprep.subr.mxu0 %v8731_v8  ;;  %5143 = vmatprep.subr.mxu1 %v6532_v28  ;;  %v8735_v28 = vand.u32 4294901760, %v8700_v34  ;;  %v7216_v34 = vand.u32 4294901760, %v134_v9 }
  0xc3   :  { %5117 = vmatpush3.msra.mxu0 %v8732_v51  ;;  %5144 = vmatpush3.msra.mxu1 %v6521_v16  ;;  %v135_v16 = vld [vmem:[%s8337_s1 + $0x2f8] sm:$0xff]  ;;  %v8754_v51 = vand.u32 4294901760, %v6948_v44 }
  0xc4   :  { %5118 = vmatprep.subr.mxu0 %v8733_v30  ;;  %5145 = vmatprep.subr.mxu1 %v8697_v18  ;;  %v7197_v58 = vand.u32 4294901760, %v135_v16  ;;  %v7205_v18 = vand.u32 4294901760, %v118_v49  ;;  %v7256_v19 = vsub.f32 %v134_v9, %v7216_v34 }
  0xc5   :  { %5119 = vmatpush3.msra.mxu0 %v8734_v55  ;;  %5146 = vmatpush3.msra.mxu1 %v8699_v11  ;;  %v7214_v11 = vsub.f32 %v119_v42, %v7183_v21  ;;  %v8755_v42 = vand.u32 4294901760, %v7001_v43  ;;  %v8756_v55 = vld [vmem:[#allocation17_spill] sm:$0xff]  ;;  %v112_v43 = vld [vmem:[%s8337_s1 + $0x240] sm:$0xff] }
  0xc6   :  { %5120 = vmatprep.subr.mxu0 %v8735_v28  ;;  %5147 = vmatprep.subr.mxu1 %v8701_v22  ;;  %v8741_v22 = vand.u32 4294901760, %v6902_v26  ;;  %v8744_v26 = vand.u32 4294901760, %v6927_v12  ;;  %v7241_v32 = vsub.f32 %v118_v49, %v7205_v18  ;;  %v131_v12 = vld [vmem:[%s8337_s1 + $0x2d8] sm:$0xff]  ;;  %v7307_v28 = vand.u32 4294901760, %v114_v45 }
  0xc7   :  { %5121 = vmatpush3.msra.mxu0 %v8736_v63  ;;  %5148 = vmatpush3.msra.mxu1 %v8703_v47  ;;  %v8742_v47 = vand.u32 4294901760, %v6849_v57  ;;  %v7243_v57 = vand.u32 4294901760, %v116_v40  ;;  %v7287_v60 = vand.u32 4294901760, %v131_v12  ;;  %v8759_v49 = vand.u32 4294901760, %v7005_v48 }
  0xc8   :  { %5122 = vmatprep.subr.mxu0 %v8737_v5  ;;  %5149 = vmatprep.subr.mxu1 %v8704_v33  ;;  %v7229_v33 = vand.u32 4294901760, %v117_v41  ;;  %v8486_v8 = vand.u32 4294901760, %v7241_v32  ;;  %8758 = vst [vmem:[#allocation23_spill] sm:$0xff] %v7307_v28  ;;  %v8760_v5 = vld [vmem:[#allocation16_spill] sm:$0xff] }
  0xc9   :  { %5123 = vmatpush3.msra.mxu0 %v8738_v36  ;;  %5150 = vmatpush3.msra.mxu1 %v8705_v17  ;;  %v132_v17 = vld [vmem:[%s8337_s1 + $0x2e0] sm:$0xff]  ;;  %8745 = vst [vmem:[#allocation18_spill] sm:$0xff] %v7243_v57  ;;  %8753 = vst [vmem:[#allocation6_spill] sm:$0xff] %v7287_v60 }
  0xca   :  { %5124 = vmatprep.subr.mxu0 %v8739_v0  ;;  %5151 = vmatprep.subr.mxu1 %v8706_v1  ;;  %8743 = vst [vmem:[#allocation5_spill] sm:$0xff] %v7229_v33  ;;  %v7235_v1 = vsub.f32 %v135_v16, %v7197_v58  ;;  %v7261_v50 = vand.u32 4294901760, %v132_v17  ;;  %v7270_v31 = vsub.f32 %v117_v41, %v7229_v33  ;;  %v8485_v16 = vand.u32 4294901760, %v7264_v62  ;;  %v8761_v0 = vld [vmem:[#allocation33_spill] sm:$0xff] }
  0xcb   :  { %5125 = vmatpush3.msra.mxu0 %v8740_v38  ;;  %5152 = vmatpush3.msra.mxu1 %v8708_v37  ;;  %v115_v37 = vld [vmem:[%s8337_s1 + $0x258] sm:$0xff]  ;;  %v8762_v41 = vand.u32 4294901760, %v8761_v0  ;;  %v7337_v48 = vsub.f32 %v7241_v32, %v8486_v8 }
  0xcc   :  { %5126 = vmatprep.subr.mxu0 %v8741_v22  ;;  %5153 = vmatprep.subr.mxu1 %v8709_v29  ;;  %v8746_v29 = vld [vmem:[#allocation25_spill] sm:$0xff]  ;;  %8749 = vst [vmem:[#allocation21_spill] sm:$0xff] %v7261_v50  ;;  %v8490_v25 = vand.u32 4294901760, %v7235_v1  ;;  %v7273_v14 = vand.u32 4294901760, %v115_v37  ;;  %v7314_v63 = vsub.f32 %v132_v17, %v7261_v50  ;;  %v8484_v6 = vand.u32 4294901760, %v7270_v31  ;;  %v8764_v17 = vld [vmem:[#allocation32_spill] sm:$0xff] }
  0xcd   :  { %5127 = vmatpush3.msra.mxu0 %v8742_v47  ;;  %5154 = vmatpush3.msra.mxu1 %v8710_v15  ;;  %v8747_v15 = vand.u32 4294901760, %v8746_v29  ;;  %v7346_v47 = vsub.f32 %v131_v12, %v7287_v60  ;;  %v8770_v12 = vld [vmem:[#allocation30_spill] sm:$0xff] }
  0xce   :  { %5128 = vmatprep.subr.mxu0 %v8744_v26  ;;  %5155 = vmatprep.subr.mxu1 %v8711_v27  ;;  %v8489_v27 = vand.u32 4294901760, %v7214_v11  ;;  %8751 = vst [vmem:[#allocation15_spill] sm:$0xff] %v7273_v14  ;;  %v7325_v9 = vsub.f32 %v7235_v1, %v8490_v25  ;;  %v7328_v36 = vsub.f32 %v115_v37, %v7273_v14  ;;  %v8765_v26 = vand.u32 4294901760, %v8764_v17  ;;  %v127_v17 = vld [vmem:[%s8337_s1 + $0x2b8] sm:$0xff] }
  0xcf   :  { %5129 = vmatpush3.msra.mxu0 %v8747_v15  ;;  %5156 = vmatpush3.msra.mxu1 %v8712_v52  ;;  %v8750_v52 = vand.u32 4294901760, %v6935_v3  ;;  %v8752_v3 = vand.u32 4294901760, %v6987_v10  ;;  %v8488_v10 = vand.u32 4294901760, %v7256_v19  ;;  %v7434_v8 = vand.u32 4294901760, %v127_v17 }
  0xd0   :  { %5130 = vmatprep.subr.mxu0 %v8748_v24  ;;  %5157 = vmatprep.subr.mxu1 %v8713_v46  ;;  %v130_v46 = vld [vmem:[%s8337_s1 + $0x2d0] sm:$0xff]  ;;  %v7296_v30 = vsub.f32 %v7214_v11, %v8489_v27  ;;  %v7359_v24 = vand.u32 4294901760, %v112_v43 }
  0xd1   :  { %5131 = vmatpush3.msra.mxu0 %v8750_v52  ;;  %5158 = vmatpush3.msra.mxu1 %v8714_v13  ;;  %v7285_v13 = vsub.f32 %v116_v40, %v7243_v57  ;;  %v7305_v44 = vand.u32 4294901760, %v130_v46  ;;  %v128_v40 = vld [vmem:[%s8337_s1 + $0x2c0] sm:$0xff]  ;;  %v7355_v29 = vsub.f32 %v7256_v19, %v8488_v10  ;;  %8775 = vst [vmem:[#allocation13_spill] sm:$0xff] %v7434_v8  ;;  %v109_v10 = vld [vmem:[%s8337_s1 + $0x228] sm:$0xff] }
  0xd2   :  { %5132 = vmatprep.subr.mxu0 %v8752_v3  ;;  %5159 = vmatprep.subr.mxu1 %v8715_v4  ;;  %v113_v4 = vld [vmem:[%s8337_s1 + $0x248] sm:$0xff]  ;;  %8768 = vst [vmem:[#allocation10_spill] sm:$0xff] %v7359_v24  ;;  %v8769_v52 = vld [vmem:[#allocation28_spill] sm:$0xff]  ;;  %v7364_v3 = vsub.f32 %v114_v45, %v7307_v28  ;;  %v2102_v45 = vand.u32 4294901760, %v7325_v9  ;;  %v7386_v0 = vand.u32 4294901760, %v128_v40 }
  0xd3   :  { %5133 = vmatpush3.msra.mxu0 %v8754_v51  ;;  %5160 = vmatpush3.msra.mxu1 %v8716_v59  ;;  %8757 = vst [vmem:[#allocation22_spill] sm:$0xff] %v7305_v44  ;;  %v129_v59 = vld [vmem:[%s8337_s1 + $0x2c8] sm:$0xff]  ;;  %v7339_v38 = vand.u32 4294901760, %v113_v4  ;;  %v8483_v22 = vand.u32 4294901760, %v7285_v13  ;;  %v7369_v51 = vsub.f32 %v7264_v62, %v8485_v16 }
  0xd4   :  { %5134 = vmatprep.subr.mxu0 %v8755_v42  ;;  %5161 = vmatprep.subr.mxu1 %v8756_v55  ;;  %v7357_v15 = vand.u32 4294901760, %v129_v59  ;;  %v8487_v42 = vand.u32 4294901760, %v7314_v63  ;;  %v111_v55 = vld [vmem:[%s8337_s1 + $0x238] sm:$0xff]  ;;  %8771 = vst [vmem:[#allocation24_spill] sm:$0xff] %v7386_v0  ;;  %v7445_v27 = vsub.f32 %v128_v40, %v7386_v0  ;;  %v7486_v40 = vand.u32 4294901760, %v109_v10 }
  0xd5   :  { %5135 = vmatpush3.msra.mxu0 %v8759_v49  ;;  %5162 = vmatpush3.msra.mxu1 %v8760_v5  ;;  %8763 = vst [vmem:[#allocation7_spill] sm:$0xff] %v7339_v38  ;;  %v7376_v49 = vsub.f32 %v130_v46, %v7305_v44  ;;  %v7384_v5 = vsub.f32 %v7270_v31, %v8484_v6 }
  0xd6   :  { %5136 = vmatprep.subr.mxu0 %v8762_v41  ;;  %5163 = vmatprep.subr.mxu1 %v6831_v35  ;;  %v8766_v35 = vld [vmem:[#allocation29_spill] sm:$0xff]  ;;  %8767 = vst [vmem:[#allocation8_spill] sm:$0xff] %v7357_v15  ;;  %v8491_v41 = vand.u32 4294901760, %v7328_v36  ;;  %v7398_v9 = vsub.f32 %v7285_v13, %v8483_v22  ;;  %v110_v22 = vld [vmem:[%s8337_s1 + $0x230] sm:$0xff]  ;;  %v7416_v6 = vsub.f32 %v129_v59, %v7357_v15  ;;  %v8494_v59 = vand.u32 4294901760, %v7364_v3 }
  0xd7   :  { %5137 = vmatpush3.msra.mxu0 %v8765_v26  ;;  %1762 = vmatprep.mubr.f32.mxu0 %v8766_v35  ;;  %v8492_v26 = vand.u32 4294901760, %v7346_v47  ;;  %v8493_v16 = vand.u32 4294901760, %v7376_v49  ;;  %8776 = vst [vmem:[#allocation14_spill] sm:$0xff] %v7445_v27  ;;  %8780 = vst [vmem:[#allocation26_spill] sm:$0xff] %v7486_v40 }
  0xd8   :  { %5164 = vmatpush3.msra.mxu1 %v8769_v52  ;;  %1764 = vmatmul.mubr.f32.vlgmr.msra.gmra.mxu0 %v8770_v12  ;;  %v7410_v52 = vand.u32 4294901760, %v111_v55 }
  0xd9   :  { %5165 = vmatprep.subr.mxu1 %v6911_v23  ;;  %5176 = vmatprep.subr.mxu0 %v7197_v58  ;;  %v7393_v23 = vsub.f32 %v113_v4, %v7339_v38  ;;  %v7408_v4 = vsub.f32 %v112_v43, %v7359_v24  ;;  %v7424_v43 = vsub.f32 %v7314_v63, %v8487_v42 }
  0xda   :  { %5166 = vmatpush3.msra.mxu1 %v6888_v61  ;;  %5177 = vmatpush3.msra.mxu0 %v7183_v21  ;;  %v2109_v61 = vand.u32 4294901760, %v7355_v29  ;;  %8774 = vst [vmem:[#allocation11_spill] sm:$0xff] %v7410_v52  ;;  %v126_v29 = vld [vmem:[%s8337_s1 + $0x2b0] sm:$0xff]  ;;  %v7439_v42 = vsub.f32 %v7328_v36, %v8491_v41  ;;  %v7453_v25 = vsub.f32 %v7346_v47, %v8492_v26  ;;  %v7455_v41 = vand.u32 4294901760, %v110_v22 }
  0xdb   :  { %8772 = vst [vmem:[#allocation9_spill] sm:$0xff] %v7393_v23  ;;  %5167 = vmatprep.subr.mxu1 %v8720_v53  ;;  %5178 = vmatprep.subr.mxu0 %v7216_v34  ;;  %8773 = vst [vmem:[#allocation12_spill] sm:$0xff] %v7408_v4  ;;  %v7469_v26 = vand.u32 4294901760, %v126_v29  ;;  %v2123_v37 = vand.u32 4294901760, %v7424_v43 }
  0xdc   :  { %5168 = vmatpush3.msra.mxu1 %v6899_v56  ;;  %5179 = vmatpush3.msra.mxu0 %v7205_v18  ;;  %8777 = vst [vmem:[#allocation19_spill] sm:$0xff] %v7455_v41  ;;  %v125_v56 = vld [vmem:[%s8337_s1 + $0x2a8] sm:$0xff]  ;;  %v7502_v53 = vsub.f32 %v110_v22, %v7455_v41  ;;  %v8786_v22 = vand.u32 4294901760, %v7416_v6 }
  0xdd   :  { %5169 = vmatprep.subr.mxu1 %v6964_v54  ;;  %5180 = vmatprep.subr.mxu0 %v7224_v39  ;;  %v7467_v54 = vsub.f32 %v111_v55, %v7410_v52  ;;  %8779 = vst [vmem:[#allocation27_spill] sm:$0xff] %v7469_v26  ;;  %v7484_v55 = vsub.f32 %v7364_v3, %v8494_v59  ;;  %v7494_v43 = vand.u32 4294901760, %v125_v56  ;;  %v2130_v59 = vand.u32 4294901760, %v7453_v25 }
  0xde   :  { %5170 = vmatpush3.msra.mxu1 %v6975_v7  ;;  %5181 = vmatpush3.msra.mxu0 %v7229_v33  ;;  %v108_v7 = vld [vmem:[%s8337_s1 + $0x220] sm:$0xff]  ;;  %v8785_v25 = vand.u32 4294901760, %v7296_v30  ;;  %v7547_v33 = vsub.f32 %v126_v29, %v7469_v26  ;;  %v106_v29 = vld [vmem:[%s8337_s1 + $0x210] sm:$0xff] }
  0xdf   :  { %5171 = vmatprep.subr.mxu1 %v6981_v2  ;;  %5182 = vmatprep.subr.mxu0 %v7261_v50  ;;  %8778 = vst [vmem:[#allocation20_spill] sm:$0xff] %v7467_v54  ;;  %v7479_v2 = vsub.f32 %v7376_v49, %v8493_v16  ;;  %8781 = vst [vmem:[#allocation31_spill] sm:$0xff] %v7494_v43  ;;  %v7497_v46 = vand.u32 4294901760, %v108_v7  ;;  %v107_v16 = vld [vmem:[%s8337_s1 + $0x218] sm:$0xff] }
  0xe0   :  { %5172 = vmatpush3.msra.mxu1 %v6983_v20  ;;  %1866 = vmatprep.mubr.f32.mxu1 %v8766_v35  ;;  %v124_v20 = vld [vmem:[%s8337_s1 + $0x2a0] sm:$0xff]  ;;  %v7510_v35 = vsub.f32 %v127_v17, %v7434_v8 }
  0xe1   :  { %5183 = vmatpush3.msra.mxu0 %v7243_v57  ;;  %1868 = vmatmul.mubr.f32.vlgmr.msra.gmra.mxu1 %v8770_v12  ;;  %8782 = vst [vmem:[#allocation25_spill] sm:$0xff] %v7497_v46  ;;  %v8783_v57 = vand.u32 4294901760, %v7393_v23  ;;  %v7526_v17 = vand.u32 4294901760, %v124_v20  ;;  %v2137_v30 = vand.u32 4294901760, %v7479_v2 }
  0xe2   :  { %5184 = vmatprep.subr.mxu0 %v7287_v60  ;;  %5211 = vmatprep.subr.mxu1 %v2102_v45  ;;  %8784 = vst [vmem:[#allocation17_spill] sm:$0xff] %v7510_v35  ;;  %v38_v45 = vld [vmem:[%s8336_s0 + $0x28] sm:$0xff]  ;;  %v8787_v60 = vand.u32 4294901760, %v7408_v4 }
  0xe3   :  { %v7507_v12 = vsub.f32 %v7393_v23, %v8783_v57  ;;  %5185 = vmatpush3.msra.mxu0 %v7273_v14  ;;  %5212 = vmatpush3.msra.mxu1 %v8785_v25  ;;  %v7524_v57 = vsub.f32 %v7416_v6, %v8786_v22  ;;  %v37_v14 = vld [vmem:[%s8336_s0 + $0x20] sm:$0xff]  ;;  %v2025_v25 = vand.u32 4294901760, %v7484_v55  ;;  %v7541_v22 = vsub.f32 %v109_v10, %v7486_v40 }
  0xe4   :  { %v7531_v50 = vsub.f32 %v7408_v4, %v8787_v60  ;;  %5186 = vmatprep.subr.mxu0 %v7305_v44  ;;  %5213 = vmatprep.subr.mxu1 %v2109_v61  ;;  %v123_v60 = vld [vmem:[%s8337_s1 + $0x298] sm:$0xff]  ;;  %v8788_v4 = vand.u32 4294901760, %v7337_v48  ;;  %v8789_v61 = vand.u32 4294901760, %v7445_v27  ;;  %v7558_v10 = vsub.f32 %v108_v7, %v7497_v46  ;;  %v122_v7 = vld [vmem:[%s8337_s1 + $0x290] sm:$0xff] }
  0xe5   :  { %5187 = vmatpush3.msra.mxu0 %v7307_v28  ;;  %v7560_v55 = vand.u32 4294901760, %v107_v16  ;;  %v7565_v44 = vand.u32 4294901760, %v38_v45  ;;  %v8791_v48 = vand.u32 4294901760, %v7369_v51  ;;  %v7576_v28 = vsub.f32 %v125_v56, %v7494_v43  ;;  %v121_v56 = vld [vmem:[%s8337_s1 + $0x288] sm:$0xff] }
  0xe6   :  { %5214 = vmatpush3.msra.mxu1 %v8788_v4  ;;  %v7555_v2 = vsub.f32 %v7445_v27, %v8789_v61  ;;  %5188 = vmatprep.subr.mxu0 %v7357_v15  ;;  %v2032_v4 = vand.u32 4294901760, %v7507_v12  ;;  %v7578_v27 = vand.u32 4294901760, %v37_v14  ;;  %v8793_v15 = vand.u32 4294901760, %v7384_v5 }
  0xe7   :  { %8790 = vst [vmem:[#allocation16_spill] sm:$0xff] %v7565_v44  ;;  %5215 = vmatprep.subr.mxu1 %v8791_v48  ;;  %5189 = vmatpush3.msra.mxu0 %v7339_v38  ;;  %v2144_v51 = vand.u32 4294901760, %v7524_v57  ;;  %v2039_v12 = vand.u32 4294901760, %v7531_v50  ;;  %v7585_v48 = vand.u32 4294901760, %v123_v60  ;;  %v8794_v61 = vand.u32 4294901760, %v7467_v54  ;;  %v105_v57 = vld [vmem:[%s8337_s1 + $0x208] sm:$0xff] }
  0xe8   :  { %8792 = vst [vmem:[#allocation33_spill] sm:$0xff] %v7578_v27  ;;  %5216 = vmatpush3.msra.mxu1 %v8793_v15  ;;  %5190 = vmatprep.subr.mxu0 %v7386_v0  ;;  %v7597_v5 = vand.u32 4294901760, %v106_v29  ;;  %v8795_v38 = vand.u32 4294901760, %v7398_v9  ;;  %v7611_v15 = vsub.f32 %v107_v16, %v7560_v55  ;;  %v7613_v0 = vand.u32 4294901760, %v122_v7  ;;  %v120_v16 = vld [vmem:[%s8337_s1 + $0x280] sm:$0xff] }
  0xe9   :  { %v7590_v23 = vsub.f32 %v7467_v54, %v8794_v61  ;;  %5217 = vmatprep.subr.mxu1 %v2123_v37  ;;  %v7604_v61 = vsub.f32 %v124_v20, %v7526_v17  ;;  %5191 = vmatpush3.msra.mxu0 %v7359_v24  ;;  %v2151_v37 = vand.u32 4294901760, %v7555_v2  ;;  %v7616_v50 = vsub.f32 %v38_v45, %v7565_v44  ;;  %v104_v9 = vld [vmem:[%s8337_s1 + $0x200] sm:$0xff] }
  0xea   :  { %5218 = vmatpush3.msra.mxu1 %v8795_v38  ;;  %8796 = vst [vmem:[#allocation32_spill] sm:$0xff] %v7613_v0  ;;  %5192 = vmatprep.subr.mxu0 %v7434_v8  ;;  %v8797_v20 = vand.u32 4294901760, %v7510_v35  ;;  %v7622_v54 = vand.u32 4294901760, %v121_v56  ;;  %v7632_v45 = vsub.f32 %v37_v14, %v7578_v27  ;;  %v7642_v8 = vsub.f32 %v123_v60, %v7585_v48 }
  0xeb   :  { %5219 = vmatprep.subr.mxu1 %v2130_v59  ;;  %5193 = vmatpush3.msra.mxu0 %v7410_v52  ;;  %v8798_v59 = vand.u32 4294901760, %v7439_v42  ;;  %v2046_v2 = vand.u32 4294901760, %v7590_v23  ;;  %v8799_v14 = vand.u32 4294901760, %v7547_v33  ;;  %v7649_v52 = vsub.f32 %v106_v29, %v7597_v5 }
  0xec   :  { %v2157_v24 = vsub.f32 %v7510_v35, %v8797_v20  ;;  %v7638_v20 = vand.u32 4294901760, %v105_v57  ;;  %5194 = vmatprep.subr.mxu0 %v7469_v26  ;;  %v8800_v42 = vand.u32 4294901760, %v7502_v53  ;;  %v7656_v60 = vand.u32 4294901760, %v120_v16  ;;  %2210 = vmatprep.mubr.f32.mxu1 %v7565_v44  ;;  %v8834_v44 = vld [vmem:[#allocation31_spill] sm:$0xff] }
  0xed   :  { %5220 = vmatpush3.msra.mxu1 %v8798_v59  ;;  %v2164_v35 = vsub.f32 %v7547_v33, %v8799_v14  ;;  %5195 = vmatpush3.msra.mxu0 %v7455_v41  ;;  %v7658_v38 = vand.u32 4294901760, %v104_v9  ;;  %v7662_v14 = vsub.f32 %v122_v7, %v7613_v0  ;;  %v8802_v7 = vand.u32 4294901760, %v7541_v22 }
  0xee   :  { %5221 = vmatprep.subr.mxu1 %v2137_v30  ;;  %v2052_v23 = vsub.f32 %v7502_v53, %v8800_v42  ;;  %5196 = vmatprep.subr.mxu0 %v7494_v43  ;;  %v2158_v29 = vand.u32 4294901760, %v2157_v24  ;;  %v8801_v42 = vand.u32 4294901760, %v7576_v28  ;;  %v7672_v30 = vsub.f32 %v105_v57, %v7638_v20 }
  0xef   :  { %5222 = vmatpush3.msra.mxu1 %v2025_v25  ;;  %5197 = vmatpush3.msra.mxu0 %v7486_v40  ;;  %v2059_v43 = vsub.f32 %v7541_v22, %v8802_v7  ;;  %v8803_v41 = vand.u32 4294901760, %v7604_v61  ;;  %v7688_v7 = vsub.f32 %v104_v9, %v7658_v38  ;;  %v8808_v9 = vand.u32 4294901760, %v7632_v45 }
  0xf0   :  { %5223 = vmatprep.subr.mxu1 %v2144_v51  ;;  %v2171_v59 = vsub.f32 %v7576_v28, %v8801_v42  ;;  %v7679_v51 = vsub.f32 %v121_v56, %v7622_v54  ;;  %5198 = vmatprep.subr.mxu0 %v7526_v17  ;;  %v2165_v42 = vand.u32 4294901760, %v2164_v35  ;;  %v2053_v25 = vand.u32 4294901760, %v2052_v23 }
  0xf1   :  { %5224 = vmatpush3.msra.mxu1 %v2032_v4  ;;  %v2178_v4 = vsub.f32 %v7604_v61, %v8803_v41  ;;  %5199 = vmatpush3.msra.mxu0 %v7497_v46  ;;  %8804 = vst [vmem:[#allocation29_spill] sm:$0xff] %v7688_v7  ;;  %v8805_v56 = vand.u32 4294901760, %v7616_v50  ;;  %v7695_v35 = vsub.f32 %v120_v16, %v7656_v60  ;;  %v8807_v23 = vand.u32 4294901760, %v7558_v10 }
  0xf2   :  { %5225 = vmatprep.subr.mxu1 %v2151_v37  ;;  %5200 = vmatprep.subr.mxu0 %v7585_v48  ;;  %v2172_v41 = vand.u32 4294901760, %v2171_v59  ;;  %v1978_v57 = vsub.f32 %v7632_v45, %v8808_v9  ;;  %v8809_v16 = vand.u32 4294901760, %v7642_v8  ;;  %v8539_v46 = vand.u32 4294901760, %v7688_v7 }
  0xf3   :  { %5226 = vmatpush3.msra.mxu1 %v2039_v12  ;;  %v1972_v24 = vsub.f32 %v7616_v50, %v8805_v56  ;;  %8806 = vst [vmem:[#allocation28_spill] sm:$0xff] %v7695_v35  ;;  %v2066_v12 = vsub.f32 %v7558_v10, %v8807_v23  ;;  %5201 = vmatpush3.msra.mxu0 %v7560_v55  ;;  %v2060_v56 = vand.u32 4294901760, %v2059_v43  ;;  %v8810_v23 = vand.u32 4294901760, %v7611_v15 }
  0xf4   :  { %5227 = vmatprep.subr.mxu1 %v2158_v29  ;;  %v2185_v37 = vsub.f32 %v7642_v8, %v8809_v16  ;;  %5202 = vmatprep.subr.mxu0 %v7613_v0  ;;  %v2179_v29 = vand.u32 4294901760, %v2178_v4  ;;  %v8540_v59 = vand.u32 4294901760, %v7695_v35  ;;  %v1979_v4 = vand.u32 4294901760, %v1978_v57 }
  0xf5   :  { %5228 = vmatpush3.msra.mxu1 %v2046_v2  ;;  %v2073_v9 = vsub.f32 %v7611_v15, %v8810_v23  ;;  %5203 = vmatpush3.msra.mxu0 %v7597_v5  ;;  %v1973_v43 = vand.u32 4294901760, %v1972_v24  ;;  %v8811_v2 = vand.u32 4294901760, %v7662_v14  ;;  %v8812_v0 = vand.u32 4294901760, %v7649_v52 }
  0xf6   :  { %5229 = vmatprep.subr.mxu1 %v2165_v42  ;;  %5204 = vmatprep.subr.mxu0 %v7622_v54  ;;  %v2067_v42 = vand.u32 4294901760, %v2066_v12  ;;  %v8813_v24 = vand.u32 4294901760, %v7679_v51  ;;  %v8814_v57 = vand.u32 4294901760, %v7672_v30 }
  0xf7   :  { %5230 = vmatpush3.msra.mxu1 %v2053_v25  ;;  %v2192_v16 = vsub.f32 %v7662_v14, %v8811_v2  ;;  %v2080_v23 = vsub.f32 %v7649_v52, %v8812_v0  ;;  %5205 = vmatpush3.msra.mxu0 %v7638_v20  ;;  %v2186_v25 = vand.u32 4294901760, %v2185_v37  ;;  %v2206_v37 = vsub.f32 %v7695_v35, %v8540_v59  ;;  %v8832_v59 = vld [vmem:[#allocation11_spill] sm:$0xff] }
  0xf8   :  { %5231 = vmatprep.subr.mxu1 %v2172_v41  ;;  %v2199_v2 = vsub.f32 %v7679_v51, %v8813_v24  ;;  %5206 = vmatprep.subr.mxu0 %v7656_v60  ;;  %v2074_v41 = vand.u32 4294901760, %v2073_v9  ;;  %v2087_v12 = vsub.f32 %v7672_v30, %v8814_v57  ;;  %v8818_v24 = vld [vmem:[#allocation21_spill] sm:$0xff] }
  0xf9   :  { %5232 = vmatpush3.msra.mxu1 %v2060_v56  ;;  %5207 = vmatpush3.msra.mxu0 %v7658_v38  ;;  %v2193_v0 = vand.u32 4294901760, %v2192_v16  ;;  %v2081_v56 = vand.u32 4294901760, %v2080_v23  ;;  %v2207_v16 = vand.u32 4294901760, %v2206_v37  ;;  %v8816_v23 = vld [vmem:[#allocation5_spill] sm:$0xff]  ;;  %v8824_v37 = vld [vmem:[#allocation15_spill] sm:$0xff] }
  0xfa   :  { %5233 = vmatprep.subr.mxu1 %v2179_v29  ;;  %1974 = vmatprep.mubr.f32.mxu0 %v1973_v43  ;;  %v2094_v29 = vsub.f32 %v7688_v7, %v8539_v46  ;;  %v2200_v9 = vand.u32 4294901760, %v2199_v2  ;;  %v2088_v43 = vand.u32 4294901760, %v2087_v12  ;;  %v8819_v2 = vld [vmem:[#allocation12_spill] sm:$0xff]  ;;  %v8821_v57 = vld [vmem:[#allocation17_spill] sm:$0xff]  ;;  %v8822_v12 = vld [vmem:[#allocation6_spill] sm:$0xff] }
  0xfb   :  { %5234 = vmatpush3.msra.mxu1 %v2067_v42  ;;  %1980 = vmatmul.mubr.f32.vlgmr.msra.gmra.mxu0 %v1979_v4  ;;  %v8815_v4 = vld [vmem:[#allocation9_spill] sm:$0xff] }
  0xfc   :  { %5235 = vmatprep.subr.mxu1 %v2186_v25  ;;  %5246 = vmatprep.subr.mxu0 %v7235_v1  ;;  %v2095_v42 = vand.u32 4294901760, %v2094_v29  ;;  %v8817_v25 = vld [vmem:[#allocation14_spill] sm:$0xff]  ;;  %v8826_v29 = vld [vmem:[#allocation23_spill] sm:$0xff]  ;;  %v8831_v46 = vld [vmem:[#allocation13_spill] sm:$0xff] }
  0xfd   :  { %5236 = vmatpush3.msra.mxu1 %v2074_v41  ;;  %5247 = vmatpush3.msra.mxu0 %v7214_v11  ;;  %v8820_v41 = vld [vmem:[#allocation18_spill] sm:$0xff] }
  0xfe   :  { %5237 = vmatprep.subr.mxu1 %v2193_v0  ;;  %5248 = vmatprep.subr.mxu0 %v7256_v19  ;;  %v8823_v0 = vld [vmem:[#allocation20_spill] sm:$0xff] }
  0xff   :  { %5238 = vmatpush3.msra.mxu1 %v2081_v56  ;;  %5249 = vmatpush3.msra.mxu0 %v7241_v32  ;;  %v8825_v56 = vld [vmem:[#allocation22_spill] sm:$0xff] }
 0x100   :  { %5239 = vmatprep.subr.mxu1 %v2200_v9  ;;  %5250 = vmatprep.subr.mxu0 %v7264_v62  ;;  %v8827_v9 = vld [vmem:[#allocation8_spill] sm:$0xff] }
 0x101   :  { %5240 = vmatpush3.msra.mxu1 %v2088_v43  ;;  %5251 = vmatpush3.msra.mxu0 %v7270_v31  ;;  %v8828_v43 = vld [vmem:[#allocation7_spill] sm:$0xff] }
 0x102   :  { %5241 = vmatprep.subr.mxu1 %v2207_v16  ;;  %5252 = vmatprep.subr.mxu0 %v7314_v63  ;;  %v8829_v16 = vld [vmem:[#allocation24_spill] sm:$0xff] }
 0x103   :  { %5242 = vmatpush3.msra.mxu1 %v2095_v42  ;;  %5253 = vmatpush3.msra.mxu0 %v7285_v13  ;;  %v8830_v42 = vld [vmem:[#allocation10_spill] sm:$0xff] }
 0x104   :  { %2212 = vmatmul.mubr.f32.vlgmr.msra.gmra.mxu1 %v7578_v27  ;;  %5254 = vmatprep.subr.mxu0 %v7346_v47  ;;  %v8833_v27 = vld [vmem:[#allocation19_spill] sm:$0xff] }
 0x105   :  { %5281 = vmatprep.subr.mxu1 %v7197_v58  ;;  %5255 = vmatpush3.msra.mxu0 %v7328_v36 }
 0x106   :  { %5282 = vmatpush3.msra.mxu1 %v7183_v21  ;;  %5256 = vmatprep.subr.mxu0 %v7376_v49 }
 0x107   :  { %5283 = vmatprep.subr.mxu1 %v7216_v34  ;;  %5257 = vmatpush3.msra.mxu0 %v7364_v3 }
 0x108   :  { %5284 = vmatpush3.msra.mxu1 %v7205_v18  ;;  %5258 = vmatprep.subr.mxu0 %v7416_v6 }
 0x109   :  { %5285 = vmatprep.subr.mxu1 %v7224_v39  ;;  %5259 = vmatpush3.msra.mxu0 %v8815_v4 }
 0x10a   :  { %5286 = vmatpush3.msra.mxu1 %v8816_v23  ;;  %5260 = vmatprep.subr.mxu0 %v8817_v25 }
 0x10b   :  { %5287 = vmatprep.subr.mxu1 %v8818_v24  ;;  %5261 = vmatpush3.msra.mxu0 %v8819_v2 }
 0x10c   :  { %5288 = vmatpush3.msra.mxu1 %v8820_v41  ;;  %5262 = vmatprep.subr.mxu0 %v8821_v57 }
 0x10d   :  { %5289 = vmatprep.subr.mxu1 %v8822_v12  ;;  %5263 = vmatpush3.msra.mxu0 %v8823_v0 }
 0x10e   :  { %5290 = vmatpush3.msra.mxu1 %v8824_v37  ;;  %5264 = vmatprep.subr.mxu0 %v7547_v33 }
 0x10f   :  { %5291 = vmatprep.subr.mxu1 %v8825_v56  ;;  %5265 = vmatpush3.msra.mxu0 %v7502_v53 }
 0x110   :  { %5292 = vmatpush3.msra.mxu1 %v8826_v29  ;;  %5266 = vmatprep.subr.mxu0 %v7576_v28 }
 0x111   :  { %5293 = vmatprep.subr.mxu1 %v8827_v9  ;;  %5267 = vmatpush3.msra.mxu0 %v7541_v22 }
 0x112   :  { %5294 = vmatpush3.msra.mxu1 %v8828_v43  ;;  %5268 = vmatprep.subr.mxu0 %v7604_v61 }
 0x113   :  { %5295 = vmatprep.subr.mxu1 %v8829_v16  ;;  %5269 = vmatpush3.msra.mxu0 %v7558_v10 }
 0x114   :  { %5296 = vmatpush3.msra.mxu1 %v8830_v42  ;;  %5270 = vmatprep.subr.mxu0 %v7642_v8 }
 0x115   :  { %5297 = vmatprep.subr.mxu1 %v8831_v46  ;;  %5271 = vmatpush3.msra.mxu0 %v7611_v15 }
 0x116   :  { %5298 = vmatpush3.msra.mxu1 %v8832_v59  ;;  %5272 = vmatprep.subr.mxu0 %v7662_v14 }
 0x117   :  { %5299 = vmatprep.subr.mxu1 %v7469_v26  ;;  %5273 = vmatpush3.msra.mxu0 %v7649_v52  ;;  %v8835_v26 = vld [vmem:[#allocation25_spill] sm:$0xff] }
 0x118   :  { %5300 = vmatpush3.msra.mxu1 %v8833_v27  ;;  %5274 = vmatprep.subr.mxu0 %v7679_v51 }
 0x119   :  { %5301 = vmatprep.subr.mxu1 %v8834_v44  ;;  %5275 = vmatpush3.msra.mxu0 %v7672_v30  ;;  %v8836_v44 = vand.u32 4294901760, %v7235_v1  ;;  %v8841_v1 = vand.u32 4294901760, %v7264_v62  ;;  %v8846_v62 = vand.u32 4294901760, %v7632_v45 }
 0x11a   :  { %5302 = vmatpush3.msra.mxu1 %v7486_v40  ;;  %5276 = vmatprep.subr.mxu0 %v7695_v35  ;;  %v8837_v40 = vand.u32 4294901760, %v7214_v11  ;;  %v8838_v35 = vld [vmem:[#allocation32_spill] sm:$0xff]  ;;  %v8842_v11 = vand.u32 4294901760, %v7270_v31  ;;  %v8848_v31 = vand.u32 4294901760, %v7328_v36 }
 0x11b   :  { %5303 = vmatprep.subr.mxu1 %v7526_v17  ;;  %5277 = vmatpush3.msra.mxu0 %v7688_v7  ;;  %v8839_v7 = vand.u32 4294901760, %v7256_v19  ;;  %v8843_v19 = vand.u32 4294901760, %v7314_v63  ;;  %v8849_v63 = vand.u32 4294901760, %v7376_v49  ;;  %v8858_v49 = vand.u32 4294901760, %v7502_v53  ;;  %v136_v53 = vld [vmem:[%s8337_s1 + $0x300] sm:$0xff] }
 0x11c   :  { %2347 = vmatprep.mubr.f32.mxu0 %v7616_v50  ;;  %5304 = vmatpush3.msra.mxu1 %v8835_v26  ;;  %v8840_v26 = vand.u32 4294901760, %v7241_v32  ;;  %v8844_v32 = vand.u32 4294901760, %v7616_v50 }
 0x11d   :  { %2350 = vmatmul.mubr.f32.vlgmr.msra.gmra.mxu0 %v7632_v45  ;;  %5305 = vmatprep.subr.mxu1 %v7585_v48  ;;  %v8859_v45 = vand.u32 4294901760, %v7576_v28  ;;  %v8862_v28 = vand.u32 4294901760, %v7558_v10  ;;  %v8865_v10 = vand.u32 4294901760, %v7662_v14  ;;  %v8870_v14 = vand.u32 4294901760, %v7672_v30 }
 0x11e   :  { %5316 = vmatprep.subr.mxu0 %v8836_v44  ;;  %5306 = vmatpush3.msra.mxu1 %v7560_v55  ;;  %v8845_v44 = vand.u32 4294901760, %v7285_v13  ;;  %v8850_v13 = vand.u32 4294901760, %v7364_v3  ;;  %v8857_v3 = vand.u32 4294901760, %v7547_v33  ;;  %v8860_v33 = vand.u32 4294901760, %v7541_v22 }
 0x11f   :  { %5317 = vmatpush3.msra.mxu0 %v8837_v40  ;;  %5307 = vmatprep.subr.mxu1 %v8838_v35  ;;  %v137_v40 = vld [vmem:[%s8337_s1 + $0x308] sm:$0xff] }
 0x120   :  { %5318 = vmatprep.subr.mxu0 %v8839_v7  ;;  %5308 = vmatpush3.msra.mxu1 %v7597_v5  ;;  %v8861_v7 = vand.u32 4294901760, %v7604_v61  ;;  %v8864_v61 = vand.u32 4294901760, %v7611_v15  ;;  %v8869_v15 = vld [vmem:[#allocation31_spill] sm:$0xff] }
 0x121   :  { %5319 = vmatpush3.msra.mxu0 %v8840_v26  ;;  %5309 = vmatprep.subr.mxu1 %v7622_v54  ;;  %v8847_v26 = vand.u32 4294901760, %v7346_v47  ;;  %v8851_v47 = vand.u32 4294901760, %v7416_v6  ;;  %v8856_v6 = vand.u32 4294901760, %v8823_v0 }
 0x122   :  { %5320 = vmatprep.subr.mxu0 %v8841_v1  ;;  %5310 = vmatpush3.msra.mxu1 %v7638_v20 }
 0x123   :  { %5321 = vmatpush3.msra.mxu0 %v8842_v11  ;;  %5311 = vmatprep.subr.mxu1 %v7656_v60 }
 0x124   :  { %5322 = vmatprep.subr.mxu0 %v8843_v19  ;;  %5312 = vmatpush3.msra.mxu1 %v7658_v38 }
 0x125   :  { %2454 = vmatprep.mubr.f32.mxu1 %v8844_v32  ;;  %5323 = vmatpush3.msra.mxu0 %v8845_v44  ;;  %v3199_v32 = vld [vmem:[%s8339_s3 + $0x20] sm:$0xff] }
 0x126   :  { %2458 = vmatmul.mubr.f32.vlgmr.msra.gmra.mxu1 %v8846_v62  ;;  %5324 = vmatprep.subr.mxu0 %v8847_v26 }
 0x127   :  { %5351 = vmatprep.subr.mxu1 %v7197_v58  ;;  %5325 = vmatpush3.msra.mxu0 %v8848_v31  ;;  %v8852_v58 = vand.u32 4294901760, %v8815_v4  ;;  %v7885_v4 = vand.u32 4294901760, %v137_v40  ;;  %v8011_v31 = vand.u32 4294901760, %v3199_v32 }
 0x128   :  { %5352 = vmatpush3.msra.mxu1 %v7183_v21  ;;  %5326 = vmatprep.subr.mxu0 %v8849_v63  ;;  %v39_v21 = vld [vmem:[%s8336_s0 + $0x30] sm:$0xff]  ;;  %v3198_v63 = vld [vmem:[%s8339_s3 + $0x18] sm:$0xff] }
 0x129   :  { %5353 = vmatprep.subr.mxu1 %v7216_v34  ;;  %5327 = vmatpush3.msra.mxu0 %v8850_v13  ;;  %v8853_v34 = vand.u32 4294901760, %v8817_v25  ;;  %v147_v36 = vsel %vm145_vm0, %v39_v21, 0  ;;  %v7896_v25 = vand.u32 4294901760, %v136_v53  ;;  %v8023_v21 = vsub.f32 %v3199_v32, %v8011_v31 }
 0x12a   :  { %5354 = vmatpush3.msra.mxu1 %v7205_v18  ;;  %5328 = vmatprep.subr.mxu0 %v8851_v47  ;;  %v8854_v18 = vand.u32 4294901760, %v8819_v2  ;;  %v7871_v50 = vand.u32 4294901760, %v147_v36  ;;  %v2842_v2 = vsub.f32 %v137_v40, %v7885_v4  ;;  %v3196_v40 = vld [vmem:[%s8339_s3 + $0x8] sm:$0xff] }
 0x12b   :  { %5355 = vmatprep.subr.mxu1 %v7224_v39  ;;  %5329 = vmatpush3.msra.mxu0 %v8852_v58  ;;  %v8855_v39 = vand.u32 4294901760, %v8821_v57  ;;  %v8871_v57 = vld [vmem:[#allocation26_spill] sm:$0xff] }
 0x12c   :  { %5356 = vmatpush3.msra.mxu1 %v8816_v23  ;;  %5330 = vmatprep.subr.mxu0 %v8853_v34  ;;  %v7891_v22 = vsub.f32 %v147_v36, %v7871_v50  ;;  %v8863_v23 = vand.u32 4294901760, %v7642_v8  ;;  %v8026_v34 = vand.u32 4294901760, %v3198_v63 }
 0x12d   :  { %5357 = vmatprep.subr.mxu1 %v8818_v24  ;;  %5331 = vmatpush3.msra.mxu0 %v8854_v18  ;;  %v8866_v24 = vld [vmem:[#allocation27_spill] sm:$0xff]  ;;  %v3197_v18 = vld [vmem:[%s8339_s3 + $0x10] sm:$0xff] }
 0x12e   :  { %5358 = vmatpush3.msra.mxu1 %v8820_v41  ;;  %5332 = vmatprep.subr.mxu0 %v8855_v39  ;;  %v8867_v41 = vand.u32 4294901760, %v7649_v52  ;;  %v2804_v8 = vand.u32 4294901760, %v7891_v22  ;;  %v8874_v52 = vld [vmem:[#allocation29_spill] sm:$0xff] }
 0x12f   :  { %5359 = vmatprep.subr.mxu1 %v8822_v12  ;;  %5333 = vmatpush3.msra.mxu0 %v8856_v6  ;;  %v8872_v12 = vld [vmem:[#allocation28_spill] sm:$0xff]  ;;  %v3337_v6 = vand.u32 4294901760, %v8023_v21 }
 0x130   :  { %5360 = vmatpush3.msra.mxu1 %v8824_v37  ;;  %5334 = vmatprep.subr.mxu0 %v8857_v3  ;;  %v8873_v0 = vand.u32 4294901760, %v8872_v12  ;;  %v8875_v37 = vand.u32 4294901760, %v8874_v52  ;;  %v8036_v3 = vand.u32 4294901760, %v3197_v18  ;;  %v4788_v12 = vpop.f32.mrf.mxu0 }
 0x131   :  { %5361 = vmatprep.subr.mxu1 %v8825_v56  ;;  %5335 = vmatpush3.msra.mxu0 %v8858_v49  ;;  %v2805_v56 = vsub.f32 %v7891_v22, %v2804_v8  ;;  %v8040_v49 = vsub.f32 %v3198_v63, %v8026_v34 }
 0x132   :  { %5362 = vmatpush3.msra.mxu1 %v8826_v29  ;;  %5336 = vmatprep.subr.mxu0 %v8859_v45  ;;  %v8877_v29 = vld [vmem:[#allocation25_spill] sm:$0xff]  ;;  %v3338_v45 = vsub.f32 %v8023_v21, %v3337_v6 }
 0x133   :  { %5363 = vmatprep.subr.mxu1 %v8827_v9  ;;  %5337 = vmatpush3.msra.mxu0 %v8860_v33  ;;  %v8878_v9 = vld [vmem:[#allocation33_spill] sm:$0xff]  ;;  %v8050_v33 = vsub.f32 %v3197_v18, %v8036_v3 }
 0x134   :  { %5364 = vmatpush3.msra.mxu1 %v8828_v43  ;;  %5338 = vmatprep.subr.mxu0 %v8861_v7  ;;  %v3344_v7 = vand.u32 4294901760, %v8040_v49 }
 0x135   :  { %5365 = vmatprep.subr.mxu1 %v8829_v16  ;;  %5339 = vmatpush3.msra.mxu0 %v8862_v28  ;;  %v2806_v16 = vand.u32 4294901760, %v2805_v56  ;;  %v3339_v28 = vand.u32 4294901760, %v3338_v45 }
 0x136   :  { %5366 = vmatpush3.msra.mxu1 %v8830_v42  ;;  %5340 = vmatprep.subr.mxu0 %v8863_v23 }
 0x137   :  { %5367 = vmatprep.subr.mxu1 %v8831_v46  ;;  %5341 = vmatpush3.msra.mxu0 %v8864_v61  ;;  %v8868_v46 = vand.u32 4294901760, %v7679_v51  ;;  %v8876_v51 = vld [vmem:[#allocation16_spill] sm:$0xff]  ;;  %v3345_v61 = vsub.f32 %v8040_v49, %v3344_v7 }
 0x138   :  { %5368 = vmatpush3.msra.mxu1 %v8832_v59  ;;  %5342 = vmatprep.subr.mxu0 %v8865_v10  ;;  %v2849_v59 = vsub.f32 %v136_v53, %v7896_v25  ;;  %v8052_v53 = vand.u32 4294901760, %v3196_v40 }
 0x139   :  { %5369 = vmatprep.subr.mxu1 %v8866_v24  ;;  %5343 = vmatpush3.msra.mxu0 %v8867_v41  ;;  %v3346_v41 = vand.u32 4294901760, %v3345_v61 }
 0x13a   :  { %5370 = vmatpush3.msra.mxu1 %v8833_v27  ;;  %5344 = vmatprep.subr.mxu0 %v8868_v46  ;;  %v2843_v27 = vand.u32 4294901760, %v2842_v2  ;;  %v2850_v30 = vand.u32 4294901760, %v2849_v59  ;;  %v8063_v23 = vsub.f32 %v3196_v40, %v8052_v53 }
 0x13b   :  { %5371 = vmatprep.subr.mxu1 %v8869_v15  ;;  %5345 = vmatpush3.msra.mxu0 %v8870_v14 }
 0x13c   :  { %5372 = vmatpush3.msra.mxu1 %v8871_v57  ;;  %5346 = vmatprep.subr.mxu0 %v8873_v0  ;;  %v2844_v43 = vsub.f32 %v2842_v2, %v2843_v27  ;;  %v2851_v42 = vsub.f32 %v2849_v59, %v2850_v30  ;;  %v3358_v24 = vand.u32 4294901760, %v8063_v23  ;;  %v4789_v0 = vpop.f32.mrf.mxu0 }
 0x13d   :  { %5373 = vmatprep.subr.mxu1 %v7526_v17  ;;  %5347 = vmatpush3.msra.mxu0 %v8875_v37  ;;  %v5799_v17 = vmov 0.0  }
 0x13e   :  { %2624 = vmatprep.mubr.f32.mxu0 %v8876_v51  ;;  %5374 = vmatpush3.msra.mxu1 %v8877_v29  ;;  %v3359_v46 = vsub.f32 %v8063_v23, %v3358_v24  ;;  %v4858_v52 = vpop.f32.mrf.mxu0 }
 0x13f   :  { %2626 = vmatmul.mubr.f32.vlgmr.msra.gmra.mxu0 %v8878_v9  ;;  %5375 = vmatprep.subr.mxu1 %v7585_v48  ;;  %v2852_v48 = vand.u32 4294901760, %v2851_v42 }
 0x140   :  { %2728 = vmatprep.mubr.f32.mxu1 %v8876_v51  ;;  %5376 = vmatpush3.msra.mxu1 %v7560_v55  ;;  %v2845_v55 = vand.u32 4294901760, %v2844_v43  ;;  %v4859_v51 = vpop.f32.mrf.mxu0 }
 0x141   :  { %5506 = vmatprep.subr.mxu0 %v5799_v17  ;;  %5377 = vmatprep.subr.mxu1 %v8838_v35  ;;  %v3200_v35 = vld [vmem:[%s8339_s3 + $0x28] sm:$0xff] }
 0x142   :  { %5507 = vmatpush3.msra.mxu0 %v7885_v4  ;;  %5378 = vmatpush3.msra.mxu1 %v7597_v5  ;;  %v7997_v19 = vand.u32 4294901760, %v3200_v35  ;;  %v4928_v29 = vpop.f32.mrf.mxu0 }
 0x143   :  { %5508 = vmatprep.subr.mxu0 %v5799_v17  ;;  %5379 = vmatprep.subr.mxu1 %v7622_v54  ;;  %v3202_v54 = vld [vmem:[%s8339_s3 + $0x38] sm:$0xff] }
 0x144   :  { %5509 = vmatpush3.msra.mxu0 %v7896_v25  ;;  %5380 = vmatpush3.msra.mxu1 %v7638_v20  ;;  %v7978_v5 = vand.u32 4294901760, %v3202_v54  ;;  %v8009_v26 = vsub.f32 %v3200_v35, %v7997_v19 }
 0x145   :  { %5510 = vmatprep.mubr.msk.f32.mxu0 %vm5800_vm1, %v5799_v17  ;;  %5381 = vmatprep.subr.mxu1 %v7656_v60 }
 0x146   :  { %5511 = vmatmul.mubr.f32.vlgmr.msra.gmra.mxu0 %v2806_v16  ;;  %5382 = vmatpush3.msra.mxu1 %v7658_v38  ;;  %v3201_v38 = vld [vmem:[%s8339_s3 + $0x30] sm:$0xff]  ;;  %v7984_v20 = vsub.f32 %v3202_v54, %v7978_v5  ;;  %v3330_v58 = vand.u32 4294901760, %v8009_v26 }
 0x147   :  { %5520 = vmatprep.subr.mxu0 %v5799_v17  ;;  %2730 = vmatmul.mubr.f32.vlgmr.msra.gmra.mxu1 %v8878_v9  ;;  %v7986_v60 = vand.u32 4294901760, %v3201_v38 }
 0x148   :  { %5513 = vmatprep.subr.mxu1 %v5799_v17  ;;  %5517 = vmatprep.mubr.msk.f32.mxu1 %vm5800_vm1, %v5799_v17  ;;  %v3316_v1 = vand.u32 4294901760, %v7984_v20  ;;  %v3331_v36 = vsub.f32 %v8009_v26, %v3330_v58 }
 0x149   :  { %5514 = vmatpush3.msra.mxu1 %v2845_v55  ;;  %5521 = vmatpush3.msra.mxu0 %v2842_v2  ;;  %v7995_v11 = vsub.f32 %v3201_v38, %v7986_v60  ;;  %v4790_v55 = vadd.f32 %v4789_v0, %v4788_v12 }
 0x14a   :  { %5515 = vmatprep.subr.mxu1 %v5799_v17  ;;  %5522 = vmatprep.subr.mxu0 %v5799_v17  ;;  %v3317_v44 = vsub.f32 %v7984_v20, %v3316_v1 }
 0x14b   :  { %5516 = vmatpush3.msra.mxu1 %v2852_v48  ;;  %5523 = vmatpush3.msra.mxu0 %v2849_v59  ;;  %v3323_v62 = vand.u32 4294901760, %v7995_v11  ;;  %v3360_v59 = vand.u32 4294901760, %v3359_v46  ;;  %v4752_v48 = vld [vmem:[%s8338_s2] ss:$0 sm:$0xff] }
 0x14c   :  { %5518 = vmatmul.mubr.f32.vlgmr.msra.gmra.mxu1 %v7871_v50  ;;  %5527 = vmatprep.subr.mxu1 %v5799_v17  ;;  %v3318_v13 = vand.u32 4294901760, %v3317_v44  ;;  %v258_v32 = vadd.f32 %v4790_v55, %v4752_v48 }
 0x14d   :  { %5524 = vmatprep.mubr.msk.f32.mxu0 %vm5800_vm1, %v5799_v17  ;;  %5528 = vmatpush3.msra.mxu1 %v7885_v4  ;;  %v3324_v47 = vsub.f32 %v7995_v11, %v3323_v62 }
 0x14e   :  { %5525 = vmatmul.mubr.f32.vlgmr.msra.gmra.mxu0 %v7891_v22  ;;  %5529 = vmatprep.subr.mxu1 %v5799_v17  ;;  %v3351_v22 = vand.u32 4294901760, %v8050_v33 }
 0x14f   :  { %5534 = vmatprep.subr.mxu0 %v5799_v17  ;;  %5530 = vmatpush3.msra.mxu1 %v7896_v25  ;;  %v3325_v39 = vand.u32 4294901760, %v3324_v47 }
 0x150   :  { %5531 = vmatprep.mubr.msk.f32.mxu1 %vm5800_vm1, %v5799_v17  ;;  %5535 = vmatpush3.msra.mxu0 %v2843_v27  ;;  %v3352_v10 = vsub.f32 %v8050_v33, %v3351_v22  ;;  %v4823_v27 = vpop.f32.mrf.mxu1 }
 0x151   :  { %5532 = vmatmul.mubr.f32.vlgmr.msra.gmra.mxu1 %v2804_v8  ;;  %5536 = vmatprep.subr.mxu0 %v5799_v17 }
 0x152   :  { %5541 = vmatprep.subr.mxu1 %v5799_v17  ;;  %5537 = vmatpush3.msra.mxu0 %v2850_v30  ;;  %v3353_v8 = vand.u32 4294901760, %v3352_v10  ;;  %v4824_v37 = vpop.f32.mrf.mxu1  ;;  %v4929_v30 = vpop.f32.mrf.mxu0 }
 0x153   :  { %5538 = vmatprep.mubr.msk.f32.mxu0 %vm5800_vm1, %v5799_v17  ;;  %5542 = vmatpush3.msra.mxu1 %v7885_v4  ;;  %v3195_v4 = vld [vmem:[%s8339_s3] sm:$0xff]  ;;  %v4825_v44 = vadd.f32 %v4824_v37, %v4823_v27  ;;  %v4930_v45 = vadd.f32 %v4929_v30, %v4928_v29 }
 0x154   :  { %5539 = vmatmul.mubr.f32.vlgmr.msra.gmra.mxu0 %v7871_v50  ;;  %5543 = vmatprep.subr.mxu1 %v5799_v17  ;;  %v4893_v56 = vpop.f32.mrf.mxu1  ;;  %v4998_v16 = vpop.f32.mrf.mxu0 }
 0x155   :  { %5545 = vmatprep.mubr.msk.f32.mxu1 %vm5800_vm1, %v5799_v17  ;;  %5544 = vmatpush3.msra.mxu1 %v7896_v25  ;;  %v8065_v25 = vand.u32 4294901760, %v3195_v4 }
 0x156   :  { %5548 = vmatprep.subr.mxu0 %v5799_v17  ;;  %5546 = vmatmul.mubr.f32.vlgmr.msra.gmra.mxu1 %v7871_v50  ;;  %v3332_v50 = vand.u32 4294901760, %v3331_v36  ;;  %v4894_v9 = vpop.f32.mrf.mxu1  ;;  %v4999_v54 = vpop.f32.mrf.mxu0 }
 0x157   :  { %5567 = vmatprep.subr.mxu1 %v5799_v17  ;;  %5583 = vmatprep.mubr.msk.f32.mxu1 %vm5800_vm1, %v5799_v17  ;;  %v8078_v2 = vsub.f32 %v3195_v4, %v8065_v25  ;;  %v4895_v36 = vadd.f32 %v4894_v9, %v4893_v56  ;;  %v5000_v46 = vadd.f32 %v4999_v54, %v4998_v16 }
 0x158   :  { %5564 = vmatprep.mubr.msk.f32.mxu0 %vm5800_vm1, %v5799_v17  ;;  %5549 = vmatpush3.msra.mxu0 %v7978_v5  ;;  %v4963_v43 = vpop.f32.mrf.mxu1 }
 0x159   :  { %5550 = vmatprep.subr.mxu0 %v5799_v17  ;;  %5568 = vmatpush3.msra.mxu1 %v3318_v13  ;;  %v3365_v15 = vand.u32 4294901760, %v8078_v2  ;;  %v4860_v13 = vadd.f32 %v4859_v51, %v4858_v52 }
 0x15a   :  { %5551 = vmatpush3.msra.mxu0 %v7986_v60  ;;  %5569 = vmatprep.subr.mxu1 %v5799_v17  ;;  %v4964_v42 = vpop.f32.mrf.mxu1 }
 0x15b   :  { %5552 = vmatprep.subr.mxu0 %v5799_v17  ;;  %5570 = vmatpush3.msra.mxu1 %v3325_v39  ;;  %v3366_v14 = vsub.f32 %v8078_v2, %v3365_v15  ;;  %v490_v39 = vadd.f32 %v4825_v44, %v258_v32  ;;  %v4965_v61 = vadd.f32 %v4964_v42, %v4963_v43 }
 0x15c   :  { %5553 = vmatpush3.msra.mxu0 %v7997_v19  ;;  %5571 = vmatprep.subr.mxu1 %v5799_v17 }
 0x15d   :  { %5554 = vmatprep.subr.mxu0 %v5799_v17  ;;  %5572 = vmatpush3.msra.mxu1 %v3332_v50  ;;  %v3367_v57 = vand.u32 4294901760, %v3366_v14  ;;  %v628_v50 = vadd.f32 %v4860_v13, %v490_v39 }
 0x15e   :  { %5555 = vmatpush3.msra.mxu0 %v8011_v31  ;;  %5573 = vmatprep.subr.mxu1 %v5799_v17  ;;  %v5033_v38 = vpop.f32.mrf.mxu1 }
 0x15f   :  { %5556 = vmatprep.subr.mxu0 %v5799_v17  ;;  %5574 = vmatpush3.msra.mxu1 %v3339_v28  ;;  %v736_v28 = vadd.f32 %v4895_v36, %v628_v50 }
 0x160   :  { %5557 = vmatpush3.msra.mxu0 %v8026_v34  ;;  %5575 = vmatprep.subr.mxu1 %v5799_v17  ;;  %v5034_v63 = vpop.f32.mrf.mxu1 }
 0x161   :  { %5558 = vmatprep.subr.mxu0 %v5799_v17  ;;  %5576 = vmatpush3.msra.mxu1 %v3346_v41 }
 0x162   :  { %5559 = vmatpush3.msra.mxu0 %v8036_v3  ;;  %5577 = vmatprep.subr.mxu1 %v5799_v17 }
 0x163   :  { %5560 = vmatprep.subr.mxu0 %v5799_v17  ;;  %5578 = vmatpush3.msra.mxu1 %v3353_v8  ;;  %v904_v8 = vadd.f32 %v4930_v45, %v736_v28 }
 0x164   :  { %5561 = vmatpush3.msra.mxu0 %v8052_v53  ;;  %5579 = vmatprep.subr.mxu1 %v5799_v17 }
 0x165   :  { %5562 = vmatprep.subr.mxu0 %v5799_v17  ;;  %5580 = vmatpush3.msra.mxu1 %v3360_v59  ;;  %v1008_v14 = vadd.f32 %v4965_v61, %v904_v8 }
 0x166   :  { %5563 = vmatpush3.msra.mxu0 %v8065_v25  ;;  %5581 = vmatprep.subr.mxu1 %v5799_v17 }
 0x167   :  { %5586 = vmatprep.subr.mxu0 %v5799_v17  ;;  %5582 = vmatpush3.msra.mxu1 %v3367_v57  ;;  %v5035_v57 = vadd.f32 %v5034_v63, %v5033_v38  ;;  %v1120_v0 = vadd.f32 %v5000_v46, %v1008_v14 }
 0x168   :  { %5605 = vmatprep.subr.mxu1 %v5799_v17 }
 0x169   :  { %v1352_v51 = vadd.f32 %v5035_v57, %v1120_v0 }
 0x176   :  { %v5068_v35 = vpop.f32.mrf.mxu0 }
 0x178   :  { %v5069_v47 = vpop.f32.mrf.mxu0 }
 0x179   :  { %v5070_v27 = vadd.f32 %v5069_v47, %v5068_v35 }
 0x17b   :  { %v1490_v55 = vadd.f32 %v5070_v27, %v1352_v51 }
 0x17f   :  { %v5103_v18 = vpop.f32.mrf.mxu1 }
 0x181   :  { %v5104_v4 = vpop.f32.mrf.mxu1 }
 0x182   :  { %v5105_v56 = vadd.f32 %v5104_v4, %v5103_v18 }
 0x184   :  { %v1598_v48 = vadd.f32 %v5105_v56, %v1490_v55 }
 0x198   :  { %v5138_v40 = vpop.f32.mrf.mxu0 }
 0x19a   :  { %v5139_v10 = vpop.f32.mrf.mxu0 }
 0x19b   :  { %v5140_v29 = vadd.f32 %v5139_v10, %v5138_v40 }
 0x19d   :  { %v1766_v44 = vadd.f32 %v5140_v29, %v1598_v48 }
 0x1a1   :  { %v5173_v41 = vpop.f32.mrf.mxu1 }
 0x1a3   :  { %v5174_v12 = vpop.f32.mrf.mxu1 }
 0x1a4   :  { %v5175_v43 = vadd.f32 %v5174_v12, %v5173_v41 }
 0x1a6   :  { %v1870_v13 = vadd.f32 %v5175_v43, %v1766_v44 }
 0x1bb   :  { %v5208_v59 = vpop.f32.mrf.mxu0 }
 0x1bd   :  { %v5209_v52 = vpop.f32.mrf.mxu0 }
 0x1be   :  { %v5210_v16 = vadd.f32 %v5209_v52, %v5208_v59 }
 0x1c0   :  { %v1982_v39 = vadd.f32 %v5210_v16, %v1870_v13 }
 0x1c4   :  { %v5243_v37 = vpop.f32.mrf.mxu1 }
 0x1c6   :  { %v5244_v30 = vpop.f32.mrf.mxu1 }
 0x1c7   :  { %v5245_v38 = vadd.f32 %v5244_v30, %v5243_v37 }
 0x1c9   :  { %v2214_v36 = vadd.f32 %v5245_v38, %v1982_v39 }
 0x1dd   :  { %v5278_v9 = vpop.f32.mrf.mxu0 }
 0x1df   :  { %v5279_v42 = vpop.f32.mrf.mxu0 }
 0x1e0   :  { %v5280_v35 = vadd.f32 %v5279_v42, %v5278_v9 }
 0x1e2   :  { %v2352_v45 = vadd.f32 %v5280_v35, %v2214_v36 }
 0x1e6   :  { %v5313_v32 = vpop.f32.mrf.mxu1 }
 0x1e8   :  { %v5314_v63 = vpop.f32.mrf.mxu1 }
 0x1e9   :  { %v5315_v50 = vadd.f32 %v5314_v63, %v5313_v32 }
 0x1eb   :  { %v2460_v61 = vadd.f32 %v5315_v50, %v2352_v45 }
 0x1ff   :  { %v5348_v54 = vpop.f32.mrf.mxu0 }
 0x201   :  { %v5349_v47 = vpop.f32.mrf.mxu0 }
 0x202   :  { %v5350_v4 = vadd.f32 %v5349_v47, %v5348_v54 }
 0x204   :  { %v2628_v41 = vadd.f32 %v5350_v4, %v2460_v61  ;;  %v4753_v4 = vld [vmem:[%s8340_s4] ss:$0 sm:$0xff] }
 0x206   :  { %v2808_v18 = vpop.f32.mrf.mxu0 }
 0x207   :  { %v5383_v40 = vpop.f32.mrf.mxu1 }
 0x208   :  { %v5512_v28 = vpop.f32.mrf.mxu0 }
 0x209   :  { %v5384_v10 = vpop.f32.mrf.mxu1 }
 0x20a   :  { %v5385_v8 = vadd.f32 %v5384_v10, %v5383_v40 }
 0x20c   :  { %v2889_v46 = vpop.f32.mrf.mxu1  ;;  %v2732_v59 = vadd.f32 %v5385_v8, %v2628_v41 }
 0x20e   :  { %v5519_v14 = vpop.f32.mrf.mxu1  ;;  %v2965_v57 = vpop.f32.mrf.mxu0  ;;  %v2809_v12 = vadd.f32 %v2808_v18, %v2732_v59 }
 0x210   :  { %v5526_v0 = vpop.f32.mrf.mxu0  ;;  %v2890_v27 = vadd.f32 %v2889_v46, %v2809_v12 }
 0x211   :  { %v3040_v52 = vpop.f32.mrf.mxu1 }
 0x212   :  { %v2966_v37 = vadd.f32 %v2965_v57, %v2890_v27 }
 0x213   :  { %v5533_v51 = vpop.f32.mrf.mxu1 }
 0x214   :  { %v3117_v56 = vpop.f32.mrf.mxu0  ;;  %v3041_v9 = vadd.f32 %v3040_v52, %v2966_v37 }
 0x216   :  { %v5540_v55 = vpop.f32.mrf.mxu0  ;;  %v3118_v29 = vadd.f32 %v3117_v56, %v3041_v9  ;;  %v3190_v30 = vpop.f32.mrf.mxu1  ;;  %v4254_v9 = vld [vmem:[%s8343_s7 + $0x8] sm:$0xff] }
 0x217   :  { %v4294_v55 = vand.u32 4294901760, %v4254_v9 }
 0x218   :  { %v3191_v48 = vadd.f32 %v3190_v30, %v3118_v29  ;;  %v5547_v43 = vpop.f32.mrf.mxu1  ;;  %v4253_v29 = vld [vmem:[%s8343_s7] sm:$0xff] }
 0x219   :  { %v4372_v30 = vsub.f32 %v4254_v9, %v4294_v55 }
 0x21a   :  { %v3194_v42 = vmax.f32 %v3191_v48, 0.0  ;;  %v4297_v48 = vand.u32 4294901760, %v4253_v29 }
 0x21b   :  { %v4373_v43 = vand.u32 4294901760, %v4372_v30 }
 0x21c   :  { %v3212_v32 = vsel %vm3210_vm2, %v3194_v42, 0  ;;  %v4379_v42 = vsub.f32 %v4253_v29, %v4297_v48 }
 0x21d   :  { %v8098_v44 = vand.u32 4294901760, %v3212_v32 }
 0x21f   :  { %v3288_v16 = vsub.f32 %v3212_v32, %v8098_v44  ;;  %5584 = vmatmul.mubr.f32.vlgmr.msra.gmra.mxu1 %v8098_v44  ;;  %v4374_v32 = vsub.f32 %v4372_v30, %v4373_v43 }
 0x220   :  { %5606 = vmatpush3.msra.mxu1 %v7978_v5  ;;  %5621 = vmatprep.mubr.msk.f32.mxu1 %vm5800_vm1, %v5799_v17 }
 0x221   :  { %v3289_v54 = vand.u32 4294901760, %v3288_v16  ;;  %5607 = vmatprep.subr.mxu1 %v5799_v17 }
 0x222   :  { %5608 = vmatpush3.msra.mxu1 %v7986_v60 }
 0x223   :  { %5609 = vmatprep.subr.mxu1 %v5799_v17  ;;  %v3290_v13 = vsub.f32 %v3288_v16, %v3289_v54 }
 0x224   :  { %5610 = vmatpush3.msra.mxu1 %v7997_v19 }
 0x225   :  { %5611 = vmatprep.subr.mxu1 %v5799_v17  ;;  %v3291_v38 = vand.u32 4294901760, %v3290_v13 }
 0x226   :  { %5612 = vmatpush3.msra.mxu1 %v8011_v31 }
 0x227   :  { %5613 = vmatprep.subr.mxu1 %v5799_v17  ;;  %5565 = vmatmul.mubr.f32.vlgmr.msra.gmra.mxu0 %v3291_v38 }
 0x228   :  { %5587 = vmatpush3.msra.mxu0 %v7984_v20  ;;  %5614 = vmatpush3.msra.mxu1 %v8026_v34 }
 0x229   :  { %5588 = vmatprep.subr.mxu0 %v5799_v17  ;;  %5615 = vmatprep.subr.mxu1 %v5799_v17 }
 0x22a   :  { %5589 = vmatpush3.msra.mxu0 %v7995_v11  ;;  %5616 = vmatpush3.msra.mxu1 %v8036_v3 }
 0x22b   :  { %5590 = vmatprep.subr.mxu0 %v5799_v17  ;;  %5617 = vmatprep.subr.mxu1 %v5799_v17 }
 0x22c   :  { %5591 = vmatpush3.msra.mxu0 %v8009_v26  ;;  %5618 = vmatpush3.msra.mxu1 %v8052_v53 }
 0x22d   :  { %5592 = vmatprep.subr.mxu0 %v5799_v17  ;;  %5619 = vmatprep.subr.mxu1 %v5799_v17 }
 0x22e   :  { %5593 = vmatpush3.msra.mxu0 %v8023_v21  ;;  %5620 = vmatpush3.msra.mxu1 %v8065_v25 }
 0x22f   :  { %5594 = vmatprep.subr.mxu0 %v5799_v17  ;;  %5622 = vmatmul.mubr.f32.vlgmr.msra.gmra.mxu1 %v3289_v54 }
 0x230   :  { %5643 = vmatprep.subr.mxu1 %v5799_v17  ;;  %5595 = vmatpush3.msra.mxu0 %v8040_v49 }
 0x231   :  { %5644 = vmatpush3.msra.mxu1 %v7978_v5  ;;  %5596 = vmatprep.subr.mxu0 %v5799_v17  ;;  %v3755_v5 = vld [vmem:[%s8341_s5 + $0x18] sm:$0xff] }
 0x232   :  { %5645 = vmatprep.subr.mxu1 %v5799_v17  ;;  %5597 = vmatpush3.msra.mxu0 %v8050_v33  ;;  %v8191_v20 = vand.u32 4294901760, %v3755_v5 }
 0x233   :  { %5646 = vmatpush3.msra.mxu1 %v7986_v60  ;;  %5598 = vmatprep.subr.mxu0 %v5799_v17  ;;  %v3754_v60 = vld [vmem:[%s8341_s5 + $0x10] sm:$0xff] }
 0x234   :  { %5647 = vmatprep.subr.mxu1 %v5799_v17  ;;  %5599 = vmatpush3.msra.mxu0 %v8063_v23  ;;  %v8199_v11 = vand.u32 4294901760, %v3754_v60 }
 0x235   :  { %5648 = vmatpush3.msra.mxu1 %v7997_v19  ;;  %5600 = vmatprep.subr.mxu0 %v5799_v17  ;;  %v3753_v19 = vld [vmem:[%s8341_s5 + $0x8] sm:$0xff] }
 0x236   :  { %5649 = vmatprep.subr.mxu1 %v5799_v17  ;;  %5601 = vmatpush3.msra.mxu0 %v8078_v2  ;;  %v8208_v26 = vsub.f32 %v3754_v60, %v8199_v11 }
 0x237   :  { %5602 = vmatprep.mubr.msk.f32.mxu0 %vm5800_vm1, %v5799_v17  ;;  %5650 = vmatpush3.msra.mxu1 %v8011_v31  ;;  %v8210_v31 = vand.u32 4294901760, %v3753_v19 }
 0x238   :  { %5603 = vmatmul.mubr.f32.vlgmr.msra.gmra.mxu0 %v3288_v16  ;;  %5624 = vmatprep.subr.mxu0 %v5799_v17  ;;  %v4375_v16 = vand.u32 4294901760, %v4374_v32 }
 0x239   :  { %5651 = vmatprep.subr.mxu1 %v5799_v17  ;;  %5625 = vmatpush3.msra.mxu0 %v3316_v1  ;;  %v8197_v1 = vsub.f32 %v3755_v5, %v8191_v20 }
 0x23a   :  { %5652 = vmatpush3.msra.mxu1 %v8026_v34  ;;  %5626 = vmatprep.subr.mxu0 %v5799_v17  ;;  %v3880_v34 = vand.u32 4294901760, %v8208_v26 }
 0x23b   :  { %5653 = vmatprep.subr.mxu1 %v5799_v17  ;;  %5627 = vmatpush3.msra.mxu0 %v3323_v62  ;;  %v3873_v62 = vand.u32 4294901760, %v8197_v1 }
 0x23c   :  { %5654 = vmatpush3.msra.mxu1 %v8036_v3  ;;  %5628 = vmatprep.subr.mxu0 %v5799_v17  ;;  %v3881_v33 = vsub.f32 %v8208_v26, %v3880_v34 }
 0x23d   :  { %5655 = vmatprep.subr.mxu1 %v5799_v17  ;;  %5629 = vmatpush3.msra.mxu0 %v3330_v58  ;;  %v3752_v58 = vld [vmem:[%s8341_s5] sm:$0xff]  ;;  %v3874_v21 = vsub.f32 %v8197_v1, %v3873_v62 }
 0x23e   :  { %5656 = vmatpush3.msra.mxu1 %v8052_v53  ;;  %5630 = vmatprep.subr.mxu0 %v5799_v17  ;;  %v8224_v3 = vand.u32 4294901760, %v3752_v58 }
 0x23f   :  { %5657 = vmatprep.subr.mxu1 %v5799_v17  ;;  %5631 = vmatpush3.msra.mxu0 %v3337_v6  ;;  %v8222_v6 = vsub.f32 %v3753_v19, %v8210_v31  ;;  %v3875_v49 = vand.u32 4294901760, %v3874_v21  ;;  %v4754_v19 = vld [vmem:[%s8342_s6] ss:$0 sm:$0xff] }
 0x240   :  { %5658 = vmatpush3.msra.mxu1 %v8065_v25  ;;  %5659 = vmatprep.mubr.msk.f32.mxu1 %vm5800_vm1, %v5799_v17 }
 0x241   :  { %5632 = vmatprep.subr.mxu0 %v5799_v17  ;;  %5660 = vmatmul.mubr.f32.vlgmr.msra.gmra.mxu1 %v8098_v44  ;;  %v3887_v53 = vand.u32 4294901760, %v8222_v6 }
 0x242   :  { %5633 = vmatpush3.msra.mxu0 %v3344_v7  ;;  %5640 = vmatprep.mubr.msk.f32.mxu0 %vm5800_vm1, %v5799_v17  ;;  %v8233_v7 = vsub.f32 %v3752_v58, %v8224_v3 }
 0x243   :  { %5634 = vmatprep.subr.mxu0 %v5799_v17  ;;  %5673 = vmatprep.subr.mxu1 %v5799_v17  ;;  %v3888_v23 = vsub.f32 %v8222_v6, %v3887_v53 }
 0x244   :  { %5635 = vmatpush3.msra.mxu0 %v3351_v22  ;;  %5681 = vmatprep.mubr.msk.f32.mxu1 %vm5800_vm1, %v5799_v17  ;;  %v3882_v22 = vand.u32 4294901760, %v3881_v33  ;;  %v3894_v25 = vand.u32 4294901760, %v8233_v7 }
 0x245   :  { %5636 = vmatprep.subr.mxu0 %v5799_v17  ;;  %5674 = vmatpush3.msra.mxu1 %v3875_v49 }
 0x246   :  { %5637 = vmatpush3.msra.mxu0 %v3358_v24  ;;  %5675 = vmatprep.subr.mxu1 %v5799_v17  ;;  %v3889_v24 = vand.u32 4294901760, %v3888_v23  ;;  %v3895_v2 = vsub.f32 %v8233_v7, %v3894_v25 }
 0x247   :  { %5638 = vmatprep.subr.mxu0 %v5799_v17  ;;  %5676 = vmatpush3.msra.mxu1 %v3882_v22 }
 0x248   :  { %5639 = vmatpush3.msra.mxu0 %v3365_v15  ;;  %5677 = vmatprep.subr.mxu1 %v5799_v17  ;;  %v3896_v15 = vand.u32 4294901760, %v3895_v2 }
 0x249   :  { %5641 = vmatmul.mubr.f32.vlgmr.msra.gmra.mxu0 %v8098_v44  ;;  %5662 = vmatprep.subr.mxu0 %v5799_v17  ;;  %v4380_v44 = vand.u32 4294901760, %v4379_v42 }
 0x24a   :  { %5670 = vmatprep.mubr.msk.f32.mxu0 %vm5800_vm1, %v5799_v17  ;;  %5663 = vmatpush3.msra.mxu0 %v8191_v20 }
 0x24b   :  { %5664 = vmatprep.subr.mxu0 %v5799_v17  ;;  %5678 = vmatpush3.msra.mxu1 %v3889_v24  ;;  %v4381_v54 = vsub.f32 %v4379_v42, %v4380_v44 }
 0x24c   :  { %5665 = vmatpush3.msra.mxu0 %v8199_v11  ;;  %5679 = vmatprep.subr.mxu1 %v5799_v17 }
 0x24d   :  { %5666 = vmatprep.subr.mxu0 %v5799_v17  ;;  %5680 = vmatpush3.msra.mxu1 %v3896_v15  ;;  %v4382_v13 = vand.u32 4294901760, %v4381_v54 }
 0x24e   :  { %5667 = vmatpush3.msra.mxu0 %v8210_v31  ;;  %5695 = vmatprep.subr.mxu1 %v5799_v17 }
 0x24f   :  { %5668 = vmatprep.subr.mxu0 %v5799_v17 }
 0x250   :  { %5669 = vmatpush3.msra.mxu0 %v8224_v3 }
 0x251   :  { %5684 = vmatprep.subr.mxu0 %v5799_v17 }
 0x2df   :  { %v3404_v63 = vpop.f32.mrf.mxu1 }
 0x2e1   :  { %v5585_v39 = vpop.f32.mrf.mxu1 }
 0x2e7   :  { %v3293_v35 = vpop.f32.mrf.mxu0 }
 0x2e8   :  { %v3294_v40 = vadd.f32 %v4753_v4, %v3293_v35 }
 0x2e9   :  { %v5566_v47 = vpop.f32.mrf.mxu0 }
 0x2ea   :  { %v3405_v61 = vadd.f32 %v3404_v63, %v3294_v40 }
 0x2ef   :  { %v3573_v36 = vpop.f32.mrf.mxu1 }
 0x2f1   :  { %v5623_v50 = vpop.f32.mrf.mxu1 }
 0x2f2   :  { %v4755_v50 = vld [vmem:[%s8344_s8] ss:$0 sm:$0xff]  ;;  %s5801_s8 = smov [#allocation2]  }
 0x2f3   :  { %s4744_s14 = sshll.u32 %s5801_s8, 4  ;;  %s4745_s14 = int_to_ptr.vmem [resolvable:$true] %s4744_s14 }
 0x2f4   :  { %s5777_s15 = scalar_lea.vmem %s4745_s14, 128  ;;  %p5782_p1 = scmp.lt.s32.totalorder %s4745_s14, %s4745_s14 }
 0x2f5   :  { %p5778_p0 = scmp.ne.s32.totalorder %s4745_s14, %s5777_s15  ;;  %p5783_p2 = scmp.lt.s32.totalorder %s5777_s15, %s5777_s15 }
 0x2f7   :  { %p5784_p3 = por %p5783_p2, %p5782_p1 }
 0x2f8   :  { %v3492_v18 = vpop.f32.mrf.mxu0 }
 0x2f9   :  { %v3493_v41 = vadd.f32 %v3492_v18, %v3405_v61  ;;  %p5785_p4 = pnand %p5784_p3, %p5778_p0 }
 0x2fa   :  { %v5604_v45 = vpop.f32.mrf.mxu0 }
 0x2fb   :  { %v3574_v8 = vadd.f32 %v3573_v36, %v3493_v41 }
 0x301   :  { %v3747_v28 = vpop.f32.mrf.mxu1 }
 0x303   :  { %v5661_v10 = vpop.f32.mrf.mxu1 }
 0x309   :  { %v3668_v46 = vpop.f32.mrf.mxu0 }
 0x30a   :  { %v3669_v59 = vadd.f32 %v3668_v46, %v3574_v8 }
 0x30b   :  { %v5642_v14 = vpop.f32.mrf.mxu0 }
 0x30c   :  { %v3748_v57 = vadd.f32 %v3747_v28, %v3669_v59 }
 0x30e   :  { %v3751_v12 = vmax.f32 %v3748_v57, 0.0 }
 0x310   :  { %v3765_v0 = vsel %vm3763_vm3, %v3751_v12, 0 }
 0x311   :  { %v3836_v27 = vand.u32 4294901760, %v3765_v0 }
 0x313   :  { %v3837_v52 = vsub.f32 %v3765_v0, %v3836_v27  ;;  %5682 = vmatmul.mubr.f32.vlgmr.msra.gmra.mxu1 %v3836_v27 }
 0x314   :  { %5696 = vmatpush3.msra.mxu1 %v8191_v20  ;;  %5703 = vmatprep.mubr.msk.f32.mxu1 %vm5800_vm1, %v5799_v17 }
 0x315   :  { %5697 = vmatprep.subr.mxu1 %v5799_v17  ;;  %v3838_v37 = vand.u32 4294901760, %v3837_v52 }
 0x316   :  { %5698 = vmatpush3.msra.mxu1 %v8199_v11 }
 0x317   :  { %5699 = vmatprep.subr.mxu1 %v5799_v17  ;;  %v3839_v51 = vsub.f32 %v3837_v52, %v3838_v37 }
 0x318   :  { %5700 = vmatpush3.msra.mxu1 %v8210_v31 }
 0x319   :  { %5701 = vmatprep.subr.mxu1 %v5799_v17  ;;  %v3840_v56 = vand.u32 4294901760, %v3839_v51 }
 0x31a   :  { %5702 = vmatpush3.msra.mxu1 %v8224_v3 }
 0x31b   :  { %5704 = vmatmul.mubr.f32.vlgmr.msra.gmra.mxu1 %v3838_v37  ;;  %5717 = vmatprep.subr.mxu1 %v5799_v17 }
 0x31c   :  { %5671 = vmatmul.mubr.f32.vlgmr.msra.gmra.mxu0 %v3840_v56  ;;  %5718 = vmatpush3.msra.mxu1 %v8191_v20 }
 0x31d   :  { %5685 = vmatpush3.msra.mxu0 %v8197_v1  ;;  %5719 = vmatprep.subr.mxu1 %v5799_v17 }
 0x31e   :  { %5686 = vmatprep.subr.mxu0 %v5799_v17  ;;  %5720 = vmatpush3.msra.mxu1 %v8199_v11 }
 0x31f   :  { %5687 = vmatpush3.msra.mxu0 %v8208_v26  ;;  %5721 = vmatprep.subr.mxu1 %v5799_v17 }
 0x320   :  { %5688 = vmatprep.subr.mxu0 %v5799_v17  ;;  %5722 = vmatpush3.msra.mxu1 %v8210_v31 }
 0x321   :  { %5689 = vmatpush3.msra.mxu0 %v8222_v6  ;;  %5723 = vmatprep.subr.mxu1 %v5799_v17 }
 0x322   :  { %5690 = vmatprep.subr.mxu0 %v5799_v17  ;;  %5692 = vmatprep.mubr.msk.f32.mxu0 %vm5800_vm1, %v5799_v17 }
 0x323   :  { %5691 = vmatpush3.msra.mxu0 %v8233_v7  ;;  %5724 = vmatpush3.msra.mxu1 %v8224_v3 }
 0x324   :  { %5725 = vmatprep.mubr.msk.f32.mxu1 %vm5800_vm1, %v5799_v17  ;;  %5693 = vmatmul.mubr.f32.vlgmr.msra.gmra.mxu0 %v3837_v52 }
 0x325   :  { %5706 = vmatprep.subr.mxu0 %v5799_v17  ;;  %5726 = vmatmul.mubr.f32.vlgmr.msra.gmra.mxu1 %v3836_v27 }
 0x326   :  { %5707 = vmatpush3.msra.mxu0 %v3873_v62  ;;  %5714 = vmatprep.mubr.msk.f32.mxu0 %vm5800_vm1, %v5799_v17 }
 0x327   :  { %5708 = vmatprep.subr.mxu0 %v5799_v17  ;;  %5735 = vmatprep.subr.mxu1 %v5799_v17 }
 0x328   :  { %5709 = vmatpush3.msra.mxu0 %v3880_v34  ;;  %5739 = vmatprep.mubr.msk.f32.mxu1 %vm5800_vm1, %v5799_v17 }
 0x329   :  { %5710 = vmatprep.subr.mxu0 %v5799_v17  ;;  %5736 = vmatpush3.msra.mxu1 %v4375_v16 }
 0x32a   :  { %5711 = vmatpush3.msra.mxu0 %v3887_v53  ;;  %5737 = vmatprep.subr.mxu1 %v5799_v17 }
 0x32b   :  { %5712 = vmatprep.subr.mxu0 %v5799_v17  ;;  %5738 = vmatpush3.msra.mxu1 %v4382_v13 }
 0x32c   :  { %5713 = vmatpush3.msra.mxu0 %v3894_v25  ;;  %5749 = vmatprep.subr.mxu1 %v5799_v17 }
 0x32d   :  { %5715 = vmatmul.mubr.f32.vlgmr.msra.gmra.mxu0 %v3836_v27  ;;  %5728 = vmatprep.subr.mxu0 %v5799_v17 }
 0x32e   :  { %5732 = vmatprep.mubr.msk.f32.mxu0 %vm5800_vm1, %v5799_v17  ;;  %5729 = vmatpush3.msra.mxu0 %v4294_v55 }
 0x32f   :  { %5730 = vmatprep.subr.mxu0 %v5799_v17 }
 0x330   :  { %5731 = vmatpush3.msra.mxu0 %v4297_v48 }
 0x331   :  { %5742 = vmatprep.subr.mxu0 %v5799_v17 }
 0x3d3   :  { %v3933_v38 = vpop.f32.mrf.mxu1 }
 0x3d5   :  { %v5683_v5 = vpop.f32.mrf.mxu1 }
 0x3db   :  { %v4090_v20 = vpop.f32.mrf.mxu1 }
 0x3dc   :  { %v3842_v60 = vpop.f32.mrf.mxu0 }
 0x3dd   :  { %v5705_v1 = vpop.f32.mrf.mxu1  ;;  %v3843_v62 = vadd.f32 %v4754_v19, %v3842_v60 }
 0x3de   :  { %v5672_v11 = vpop.f32.mrf.mxu0 }
 0x3df   :  { %v3934_v58 = vadd.f32 %v3933_v38, %v3843_v62 }
 0x3e4   :  { %v4013_v26 = vpop.f32.mrf.mxu0 }
 0x3e5   :  { %v4248_v31 = vpop.f32.mrf.mxu1  ;;  %v4014_v6 = vadd.f32 %v4013_v26, %v3934_v58 }
 0x3e6   :  { %v5694_v21 = vpop.f32.mrf.mxu0 }
 0x3e7   :  { %v5727_v34 = vpop.f32.mrf.mxu1  ;;  %v4091_v3 = vadd.f32 %v4090_v20, %v4014_v6 }
 0x3ed   :  { %v4173_v49 = vpop.f32.mrf.mxu0 }
 0x3ee   :  { %v4174_v33 = vadd.f32 %v4173_v49, %v4091_v3 }
 0x3ef   :  { %v5716_v53 = vpop.f32.mrf.mxu0 }
 0x3f0   :  { %v4249_v7 = vadd.f32 %v4248_v31, %v4174_v33 }
 0x3f2   :  { %v4252_v22 = vmax.f32 %v4249_v7, 0.0 }
 0x3f4   :  { %v4263_v23 = vsel %vm145_vm0, %v4252_v22, 0 }
 0x3f5   :  { %v4332_v25 = vand.u32 4294901760, %v4263_v23 }
 0x3f7   :  { %v4333_v24 = vsub.f32 %v4263_v23, %v4332_v25  ;;  %5740 = vmatmul.mubr.f32.vlgmr.msra.gmra.mxu1 %v4332_v25 }
 0x3f8   :  { %5750 = vmatpush3.msra.mxu1 %v4294_v55  ;;  %5753 = vmatprep.mubr.msk.f32.mxu1 %vm5800_vm1, %v5799_v17 }
 0x3f9   :  { %5751 = vmatprep.subr.mxu1 %v5799_v17  ;;  %v4334_v2 = vand.u32 4294901760, %v4333_v24 }
 0x3fa   :  { %5752 = vmatpush3.msra.mxu1 %v4297_v48 }
 0x3fb   :  { %5754 = vmatmul.mubr.f32.vlgmr.msra.gmra.mxu1 %v4334_v2  ;;  %5763 = vmatprep.subr.mxu1 %v5799_v17  ;;  %v4335_v15 = vsub.f32 %v4333_v24, %v4334_v2 }
 0x3fc   :  { %5764 = vmatpush3.msra.mxu1 %v4294_v55  ;;  %5767 = vmatprep.mubr.msk.f32.mxu1 %vm5800_vm1, %v5799_v17 }
 0x3fd   :  { %5765 = vmatprep.subr.mxu1 %v5799_v17  ;;  %v4336_v63 = vand.u32 4294901760, %v4335_v15 }
 0x3fe   :  { %5766 = vmatpush3.msra.mxu1 %v4297_v48 }
 0x3ff   :  { %5733 = vmatmul.mubr.f32.vlgmr.msra.gmra.mxu0 %v4336_v63  ;;  %5768 = vmatmul.mubr.f32.vlgmr.msra.gmra.mxu1 %v4332_v25 }
 0x400   :  { %5743 = vmatpush3.msra.mxu0 %v4372_v30  ;;  %5746 = vmatprep.mubr.msk.f32.mxu0 %vm5800_vm1, %v5799_v17 }
 0x401   :  { %5744 = vmatprep.subr.mxu0 %v5799_v17 }
 0x402   :  { %5745 = vmatpush3.msra.mxu0 %v4379_v42 }
 0x403   :  { %5756 = vmatprep.subr.mxu0 %v5799_v17  ;;  %5747 = vmatmul.mubr.f32.vlgmr.msra.gmra.mxu0 %v4333_v24 }
 0x404   :  { %5757 = vmatpush3.msra.mxu0 %v4373_v43  ;;  %5760 = vmatprep.mubr.msk.f32.mxu0 %vm5800_vm1, %v5799_v17 }
 0x405   :  { %5758 = vmatprep.subr.mxu0 %v5799_v17 }
 0x406   :  { %5759 = vmatpush3.msra.mxu0 %v4380_v44 }
 0x407   :  { %5761 = vmatmul.mubr.f32.vlgmr.msra.gmra.mxu0 %v4332_v25 }
 0x4b7   :  { %v4419_v39 = vpop.f32.mrf.mxu1 }
 0x4b9   :  { %v5741_v35 = vpop.f32.mrf.mxu1 }
 0x4bb   :  { %v4570_v47 = vpop.f32.mrf.mxu1 }
 0x4bd   :  { %v5755_v36 = vpop.f32.mrf.mxu1 }
 0x4bf   :  { %v4338_v18 = vpop.f32.mrf.mxu0  ;;  %v4720_v45 = vpop.f32.mrf.mxu1 }
 0x4c0   :  { %v4339_v4 = vadd.f32 %v4755_v50, %v4338_v18 }
 0x4c1   :  { %v5734_v40 = vpop.f32.mrf.mxu0  ;;  %v5769_v28 = vpop.f32.mrf.mxu1 }
 0x4c2   :  { %v4420_v61 = vadd.f32 %v4419_v39, %v4339_v4 }
 0x4c3   :  { %v4495_v10 = vpop.f32.mrf.mxu0 }
 0x4c4   :  { %v4496_v41 = vadd.f32 %v4495_v10, %v4420_v61 }
 0x4c5   :  { %v5748_v8 = vpop.f32.mrf.mxu0 }
 0x4c6   :  { %v4571_v17 = vadd.f32 %v4570_v47, %v4496_v41 }
 0x4c7   :  { %v4647_v46 = vpop.f32.mrf.mxu0 }
 0x4c8   :  { %v4648_v59 = vadd.f32 %v4647_v46, %v4571_v17 }
 0x4c9   :  { %v5762_v14 = vpop.f32.mrf.mxu0 }
 0x4ca   :  { %v4721_v57 = vadd.f32 %v4720_v45, %v4648_v59 }
 0x4cc   :  { %v4725_v12 = vsel %vm4724_vm4, %v4721_v57, -inf }
 0x4cd   :  { %4726 = vmax.xlane.f32.xlu0 %v4725_v12 }
 0x556   :  { %v4727_v0 = vpop.xlane.xlu0 %4726 }
 0x557   :  { %v4728_v27 = vsub.f32 %v4721_v57, %v4727_v0 }
 0x559   :  { %v4729_v52 = vmul.f32 1.442695, %v4728_v27 }
 0x55b   :  { %5773 = vpow2.f32 %v4729_v52 }
 0x568   :  { %v5774_v37 = vpop.eup %5773 }
 0x569   :  { %v4731_v51 = vsel %vm4724_vm4, %v5774_v37, 0.0 }
 0x56a   :  { %4732 = vadd.xlane.f32.xlu0 %v4731_v51 }
 0x5f3   :  { %v4733_v56 = vpop.xlane.xlu0 %4732 }
 0x5f4   :  { %5775 = vrcp.f32 %v4733_v56 }
 0x601   :  { %v5776_v9 = vpop.eup %5775 }
 0x602   :  { %v4736_v55 = vmul.f32 %v5776_v9, %v5774_v37 }
 0x604   :  { %4737 = vst.msk [vmem:[#allocation2] sm:$0xff] %vm4724_vm4, %v4736_v55 }
 0x605   :  { %5788 = shalt.err (!%p5785_p4)
}
 0x606   :  { %4747 = dma.vmem_to_hbm [thread:$0]  %s4745_s14, 128, %s8345_s9, [#allocation3]  }
 0x607   :  { %5797 = dma.done.wait [#allocation3], 128  }
 0x608   :  { %5798 = vsyncadd [#allocation3], 4294967168 }
 0x609   :  { %4751 = vsyncpa [#allocation3], 1 }

</bundles_post_ra>
